<compile_context>
chip_gen: v6e
topology: v6e:2x2x1
jax: 0.10.0
libtpu: 0.0.40
codegen_flags: <defaults>
</compile_context>

<pallas_src>
import functools

import jax
import jax.numpy as jnp
from jax.experimental import pallas as pl
from jax.experimental.pallas import tpu as pltpu


# ----------------------------------------------------------------------------
# helpers
# ----------------------------------------------------------------------------
def _bilinear_matrix(n_in, n_out, dtype=jnp.float32):
    """(n_out, n_in) matrix for 1-D bilinear resize with align_corners=True."""
    assert n_in > 1 and n_out > 1
    o = jnp.arange(n_out, dtype=jnp.float32)
    src = o * (float(n_in - 1) / float(n_out - 1))
    i0 = jnp.clip(jnp.floor(src).astype(jnp.int32), 0, n_in - 1)
    i1 = jnp.minimum(i0 + 1, n_in - 1)
    frac = src - i0.astype(jnp.float32)
    A = ((1.0 - frac)[:, None] * jax.nn.one_hot(i0, n_in, dtype=dtype)
         + frac[:, None] * jax.nn.one_hot(i1, n_in, dtype=dtype))
    return A.astype(dtype)


def _erf(z):
    # Abramowitz & Stegun 7.1.26, |err| <= 1.5e-7.  exp / reciprocal go to the EUP.
    a1, a2, a3, a4, a5 = (0.254829592, -0.284496736, 1.421413741,
                          -1.453152027, 1.061405429)
    q = 0.3275911
    s = jnp.where(z < 0.0, -1.0, 1.0)
    az = jnp.abs(z)
    t = pl.reciprocal(1.0 + q * az, approx=False)
    poly = t * (a1 + t * (a2 + t * (a3 + t * (a4 + t * a5))))
    return s * (1.0 - poly * jnp.exp(-az * az))


def _vmem_capacity_bytes():
    """Physical VMEM per core (128 MiB v5e/v6e, 64 MiB v7x); conservative fallback."""
    try:
        cap = getattr(pltpu.get_tpu_info(), "vmem_capacity_bytes", None)
        if cap:
            return int(cap)
    except Exception:
        pass
    return 64 * 1024 * 1024


def _pick_row_tile(H, W, C_in, C_out, k, budget_bytes):
    """Largest output-row tile TH (divisor of 2H, preferring multiples of 8) whose
    FULL per-program resident set (blocks, scratches, temporaries) fits budget."""
    H2, W2 = 2 * H, 2 * W
    p = k // 2
    W2p = W2 + 2 * p
    Kt = k * k * C_in

    def footprint(th):
        b = 0
        b += 2 * C_out * H2 * W2 * 4          # resident output block
        b += 2 * C_in * H * W * 4             # input block (double-buffered)
        b += 2 * k * th * H * 4               # Ah_stk tile (double-buffered)
        b += 2 * W * W2p * 4                  # AwT_ext
        b += 2 * C_out * th * Kt * th * 4     # block-diagonal weights
        b += C_in * H * W2p * 4               # xh scratch
        b += C_in * k * th * W2p * 4          # vertical-upsample scratch
        b += 2 * C_out * th * W2 * 4          # psum / pssq scratch
        b += 3 * Kt * th * W2 * 4             # conv rhs temporaries
        b += 4 * C_out * th * W2 * 4          # acc & friends
        b += 4 * H2 * W2 * 4                  # epilogue per-channel temporaries
        return b

    divisors = [d for d in range(1, H2 + 1) if H2 % d == 0]
    preferred = [d for d in divisors if d % 8 == 0] or divisors
    for d in sorted(preferred, reverse=True):
        if footprint(d) <= budget_bytes:
            return d
    return min(preferred)


# ----------------------------------------------------------------------------
# fused kernel: bilinear 2x upsample + conv + InstanceNorm + exact GELU
# ----------------------------------------------------------------------------
def _fused_kernel(x_ref, ah_ref, awt_ref, w_ref, o_ref,
                  xh_ref, v_ref, psum_ref, pssq_ref,
                  *, C_in, C_out, H, W, k, TH, eps):
    # x_ref    : (1, C_in*H, W)            original image (resident over row tiles)
    # ah_ref   : (1, k*TH, H)              vertical bilinear rows for this strip,
    #                                      pre-stacked over the k conv rows (ky)
    # awt_ref  : (W, W2+2p)                horiz. bilinear matrix, zero-pad columns
    # w_ref    : (C_out*TH, k*k*C_in*TH)   block-diagonal conv weights
    # o_ref    : (1, C_out, H2, W2)        resident output block (raw conv rows
    #                                      until the last-tile norm+GELU epilogue)
    # xh_ref   : (C_in*H, W2+2p)           scratch: horizontally upsampled image
    # v_ref    : (C_in*k*TH, W2+2p)        scratch: vertically upsampled strip
    # psum/pssq: (C_out*TH, W2)            scratch: InstanceNorm partial sums
    W2 = 2 * W
    kTH = k * TH
    t = pl.program_id(1)
    n_t = pl.num_programs(1)

    # ---- per-image work, hoisted to the first row tile ----------------------
    @pl.when(t == 0)
    def _():
        # horizontal 2x bilinear upsample; the conv's horizontal zero padding is
        # already present as zero columns of awt, so no pad op happens in-kernel.
        xh_ref[...] = jnp.dot(x_ref[0], awt_ref[...],
                              preferred_element_type=jnp.float32)
        psum_ref[...] = jnp.zeros_like(psum_ref)
        pssq_ref[...] = jnp.zeros_like(pssq_ref)

    # ---- vertical 2x bilinear upsample for this strip ------------------------
    # ah already carries one copy of the strip per conv row ky (and the conv's
    # vertical zero padding as zero rows of Ah_ext), so no per-ky sublane slicing
    # or concatenation is needed afterwards.
    ah = ah_ref[0]                                          # (k*TH, H)
    for c in range(C_in):
        v_ref[c * kTH:(c + 1) * kTH, :] = jnp.dot(
            ah, xh_ref[c * H:(c + 1) * H, :],
            preferred_element_type=jnp.float32)
    v = v_ref[...]                                          # (C_in*k*TH, W2+2p)

    # ---- horizontal conv taps: static window slices of the padded rows ------
    # (lane-rotate + mask under the hood, no zero-slab buffers)
    rhs = jnp.concatenate([v[:, kx:kx + W2] for kx in range(k)], axis=0)
    # rhs: (k*k*C_in*TH, W2), row order (kx, c, ky, i)

    # ---- whole conv row-strip as ONE MXU matmul ------------------------------
    acc = jnp.dot(w_ref[...], rhs,
                  preferred_element_type=jnp.float32)       # (C_out*TH, W2)

    # ---- InstanceNorm partial sums (reduced once, in the epilogue) -----------
    psum_ref[...] += acc
    pssq_ref[...] += acc * acc

    # ---- dense block stores into the resident output block -------------------
    row0 = pl.multiple_of(t * TH, TH)
    for co in range(C_out):
        o_ref[0, co, pl.ds(row0, TH), :] = acc[co * TH:(co + 1) * TH, :]

    # ---- last tile: normalize + exact GELU over the whole resident image -----
    @pl.when(t == n_t - 1)
    def _():
        inv_hw = 1.0 / float(4 * H * W)
        for co in range(C_out):
            s = jnp.sum(jnp.sum(psum_ref[co * TH:(co + 1) * TH, :],
                                axis=1, keepdims=True), axis=0, keepdims=True)
            ss = jnp.sum(jnp.sum(pssq_ref[co * TH:(co + 1) * TH, :],
                                 axis=1, keepdims=True), axis=0, keepdims=True)
            mean = s * inv_hw                                 # (1, 1)
            var = jnp.maximum(ss * inv_hw - mean * mean, 0.0)
            inv_std = jax.lax.rsqrt(var + eps)
            y = o_ref[0, co, :, :]                            # (H2, W2)
            xn = (y - mean) * inv_std
            o_ref[0, co, :, :] = 0.5 * xn * (1.0 + _erf(xn * 0.7071067811865476))


# ----------------------------------------------------------------------------
# wrapper
# ----------------------------------------------------------------------------
def up_scale_van_forward(x, weight, *, kernel_size, eps=1e-5, row_tile=None):
    """x: (N, C_in, H, W) f32; weight: (C_in//2, C_in, k, k) -> (N, C_in//2, 2H, 2W)."""
    N, C_in, H, W = x.shape
    C_out = int(weight.shape[0])
    k = int(kernel_size)
    p = k // 2
    H2, W2 = 2 * H, 2 * W
    W2p = W2 + 2 * p
    Kt = k * k * C_in

    # generation-aware VMEM budget: ~48 MiB on v7x (64 MiB phys), ~96 MiB on v5e/v6e
    vmem_cap = _vmem_capacity_bytes()
    vmem_limit = max(32 * 1024 * 1024,
                     min(vmem_cap * 3 // 4, 100 * 1024 * 1024))

    TH = (_pick_row_tile(H, W, C_in, C_out, k, vmem_limit - (8 << 20))
          if row_tile is None else int(row_tile))
    assert H2 % TH == 0, (H2, TH)
    n_t = H2 // TH
    kTH = k * TH

    f32 = jnp.float32
    # 1-D bilinear (align_corners=True) matrices.  The conv's zero padding is
    # absorbed host-side: horizontally as zero columns of AwT_ext, vertically as
    # zero rows of Ah_ext.
    Aw = _bilinear_matrix(W, W2, f32)                       # (W2, W)
    AwT_ext = jnp.concatenate(
        [jnp.zeros((W, p), f32), Aw.T, jnp.zeros((W, p), f32)], axis=1)  # (W, W2p)

    Ah = _bilinear_matrix(H, H2, f32)                       # (H2, H)
    Ah_ext = jnp.pad(Ah, ((p, p), (0, 0)))                  # (H2+2p, H)
    # Ah_stk[t, ky*TH + i, :] = Ah_ext[t*TH + ky + i, :]
    rows = (jnp.arange(n_t)[:, None, None] * TH
            + jnp.arange(k)[None, :, None]
            + jnp.arange(TH)[None, None, :]).reshape(-1)
    Ah_stk = Ah_ext[rows].reshape(n_t, kTH, H)

    # block-diagonal conv weights: wblk[co*TH+i, K*TH+i'] = Wm[co, K] * (i == i'),
    # K ordered (kx, c, ky) to match the tap rows built in the kernel.
    Wm = jnp.transpose(weight.astype(f32), (0, 3, 1, 2)).reshape(C_out, Kt)
    wblk = jnp.einsum('ok,ij->oikj', Wm,
                      jnp.eye(TH, dtype=f32)).reshape(C_out * TH, Kt * TH)

    x2 = x.astype(f32).reshape(N, C_in * H, W)

    kern = functools.partial(_fused_kernel, C_in=C_in, C_out=C_out, H=H, W=W,
                             k=k, TH=TH, eps=eps)
    out = pl.pallas_call(
        kern,
        out_shape=jax.ShapeDtypeStruct((N, C_out, H2, W2), f32),
        grid_spec=pltpu.PrefetchScalarGridSpec(
            num_scalar_prefetch=0,
            grid=(N, n_t),
            in_specs=[
                pl.BlockSpec((1, C_in * H, W), lambda n, t: (n, 0, 0)),
                pl.BlockSpec((1, kTH, H), lambda n, t: (t, 0, 0)),
                pl.BlockSpec((W, W2p), lambda n, t: (0, 0)),
                pl.BlockSpec((C_out * TH, Kt * TH), lambda n, t: (0, 0)),
            ],
            out_specs=pl.BlockSpec((1, C_out, H2, W2),
                                   lambda n, t: (n, 0, 0, 0)),
            scratch_shapes=[
                pltpu.VMEM((C_in * H, W2p), f32),     # horizontally upsampled image
                pltpu.VMEM((C_in * kTH, W2p), f32),   # vertical-upsample strip
                pltpu.VMEM((C_out * TH, W2), f32),    # InstanceNorm sum partials
                pltpu.VMEM((C_out * TH, W2), f32),    # InstanceNorm sum-sq partials
            ],
        ),
        compiler_params=pltpu.CompilerParams(
            dimension_semantics=("parallel", "arbitrary"),
            vmem_limit_bytes=int(vmem_limit),
        ),
    )(x2, Ah_stk, AwT_ext, wblk)
    return out.astype(x.dtype)


# ----------------------------------------------------------------------------
# pure-JAX reference (for correctness check)
# ----------------------------------------------------------------------------
def _reference(x, weight, kernel_size, eps=1e-5):
    N, C_in, H, W = x.shape
    k = kernel_size
    pad = k // 2
    Ah = _bilinear_matrix(H, 2 * H, x.dtype)
    Aw = _bilinear_matrix(W, 2 * W, x.dtype)
    up = jnp.einsum('oh,nchw,pw->ncop', Ah, x, Aw,
                    precision=jax.lax.Precision.HIGHEST)
    y = jax.lax.conv_general_dilated(
        up, weight, window_strides=(1, 1), padding=[(pad, pad), (pad, pad)],
        dimension_numbers=('NCHW', 'OIHW', 'NCHW'),
        precision=jax.lax.Precision.HIGHEST)
    mean = y.mean(axis=(2, 3), keepdims=True)
    var = ((y - mean) ** 2).mean(axis=(2, 3), keepdims=True)
    yn = (y - mean) * jax.lax.rsqrt(var + eps)
    return jax.nn.gelu(yn, approximate=False)


# ----------------------------------------------------------------------------
if __name__ == "__main__":
    key = jax.random.PRNGKey(0)
    k_x, k_w = jax.random.split(key)

    in_channel = 4
    kernel_size = 3
    N, H, W = 2, 16, 16

    x = jax.random.normal(k_x, (N, in_channel, H, W), dtype=jnp.float32)
    # Conv2d(in_channel, in_channel//2, k, stride=1, bias=False) weight
    weight = 0.1 * jax.random.normal(
        k_w, (in_channel // 2, in_channel, kernel_size, kernel_size),
        dtype=jnp.float32)

    # row_tile=8 -> 4 row tiles: exercises the tiled InstanceNorm accumulation path.
    out = up_scale_van_forward(x, weight, kernel_size=kernel_size, row_tile=8)
    out = jax.block_until_ready(out)

    assert out.shape == (N, in_channel // 2, 2 * H, 2 * W), out.shape

    ref = jax.block_until_ready(_reference(x, weight, kernel_size))
    max_err = float(jnp.max(jnp.abs(out - ref)))
    assert max_err < 1e-3, f"max abs err too large: {max_err}"

    print("KERNEL_OK")
</pallas_src>

<mosaic_0001>
module attributes {stable_mosaic.version = 11 : i64} {
  func.func @_fused_kernel(%arg0: i32, %arg1: i32, %arg2: memref<1x64x16xf32, #tpu.memory_space<vmem>>, %arg3: memref<1x24x16xf32, #tpu.memory_space<vmem>>, %arg4: memref<16x34xf32, #tpu.memory_space<vmem>>, %arg5: memref<16x288xf32, #tpu.memory_space<vmem>>, %arg6: memref<1x2x32x32xf32, #tpu.memory_space<vmem>>, %arg7: memref<64x34xf32, #tpu.memory_space<vmem>>, %arg8: memref<96x34xf32, #tpu.memory_space<vmem>>, %arg9: memref<16x32xf32, #tpu.memory_space<vmem>>, %arg10: memref<16x32xf32, #tpu.memory_space<vmem>>) attributes {dimension_semantics = [#tpu.dimension_semantics<parallel>, #tpu.dimension_semantics<arbitrary>], iteration_bounds = array<i64: 2, 4>, scalar_prefetch = 0 : i64, scratch_operands = 4 : i64, tpu.core_type = #tpu.core_type<tc>, window_params = [{transform_indices = @transform_0, window_bounds = array<i64: 1, 64, 16>}, {transform_indices = @transform_1, window_bounds = array<i64: 1, 24, 16>}, {pipeline_mode = #tpu.pipeline_mode<synchronous>, transform_indices = @transform_2, window_bounds = array<i64: 16, 34>}, {pipeline_mode = #tpu.pipeline_mode<synchronous>, transform_indices = @transform_3, window_bounds = array<i64: 16, 288>}, {transform_indices = @transform_4, window_bounds = array<i64: 1, 2, 32, 32>}]} {
    %c0_i32 = arith.constant 0 : i32
    %0 = arith.cmpi eq, %arg1, %c0_i32 : i32
    %1 = arith.extui %0 : i1 to i32
    %c0_i32_0 = arith.constant 0 : i32
    %2 = arith.cmpi ne, %1, %c0_i32_0 : i32
    scf.if %2 {
      %c0_36 = arith.constant 0 : index
      %c0_37 = arith.constant 0 : index
      %c0_38 = arith.constant 0 : index
      %46 = vector.load %arg2[%c0_36, %c0_37, %c0_38] : memref<1x64x16xf32, #tpu.memory_space<vmem>>, vector<1x64x16xf32>
      %47 = vector.shape_cast %46 : vector<1x64x16xf32> to vector<64x16xf32>
      %c0_39 = arith.constant 0 : index
      %c0_40 = arith.constant 0 : index
      %48 = vector.load %arg4[%c0_39, %c0_40] : memref<16x34xf32, #tpu.memory_space<vmem>>, vector<16x34xf32>
      %cst_41 = arith.constant dense<0.000000e+00> : vector<64x34xf32>
      %49 = tpu.matmul %47, %48, %cst_41 {dimension_numbers = #tpu.dot_dimension_numbers<[1], [0], [0], [1], [0, 0, 1, 1], [], []>} : vector<64x16xf32>, vector<16x34xf32>, vector<64x34xf32> -> vector<64x34xf32>
      %c0_42 = arith.constant 0 : index
      %c0_43 = arith.constant 0 : index
      %50 = vector.load %arg7[%c0_42, %c0_43] : memref<64x34xf32, #tpu.memory_space<vmem>>, vector<64x34xf32>
      tpu.vector_store %arg7[%c0_42, %c0_43], %49 {strides = array<i32>} : memref<64x34xf32, #tpu.memory_space<vmem>>, vector<64x34xf32>,
      %cst_44 = arith.constant 0.000000e+00 : f32
      %51 = vector.broadcast %cst_44 : f32 to vector<16x32xf32>
      %c0_45 = arith.constant 0 : index
      %c0_46 = arith.constant 0 : index
      %52 = vector.load %arg9[%c0_45, %c0_46] : memref<16x32xf32, #tpu.memory_space<vmem>>, vector<16x32xf32>
      tpu.vector_store %arg9[%c0_45, %c0_46], %51 {strides = array<i32>} : memref<16x32xf32, #tpu.memory_space<vmem>>, vector<16x32xf32>,
      %cst_47 = arith.constant 0.000000e+00 : f32
      %53 = vector.broadcast %cst_47 : f32 to vector<16x32xf32>
      %c0_48 = arith.constant 0 : index
      %c0_49 = arith.constant 0 : index
      %54 = vector.load %arg10[%c0_48, %c0_49] : memref<16x32xf32, #tpu.memory_space<vmem>>, vector<16x32xf32>
      tpu.vector_store %arg10[%c0_48, %c0_49], %53 {strides = array<i32>} : memref<16x32xf32, #tpu.memory_space<vmem>>, vector<16x32xf32>,
    } else {
    }
    %c0 = arith.constant 0 : index
    %c0_1 = arith.constant 0 : index
    %c0_2 = arith.constant 0 : index
    %3 = vector.load %arg3[%c0, %c0_1, %c0_2] : memref<1x24x16xf32, #tpu.memory_space<vmem>>, vector<1x24x16xf32>
    %4 = vector.shape_cast %3 : vector<1x24x16xf32> to vector<24x16xf32>
    %c0_3 = arith.constant 0 : index
    %c0_4 = arith.constant 0 : index
    %5 = vector.load %arg7[%c0_3, %c0_4] : memref<64x34xf32, #tpu.memory_space<vmem>>, vector<16x34xf32>
    %cst = arith.constant dense<0.000000e+00> : vector<24x34xf32>
    %6 = tpu.matmul %4, %5, %cst {dimension_numbers = #tpu.dot_dimension_numbers<[1], [0], [0], [1], [0, 0, 1, 1], [], []>} : vector<24x16xf32>, vector<16x34xf32>, vector<24x34xf32> -> vector<24x34xf32>
    %c0_5 = arith.constant 0 : index
    %c0_6 = arith.constant 0 : index
    %7 = vector.load %arg8[%c0_5, %c0_6] : memref<96x34xf32, #tpu.memory_space<vmem>>, vector<24x34xf32>
    tpu.vector_store %arg8[%c0_5, %c0_6], %6 {strides = array<i32>} : memref<96x34xf32, #tpu.memory_space<vmem>>, vector<24x34xf32>,
    %c16 = arith.constant 16 : index
    %c0_7 = arith.constant 0 : index
    %8 = vector.load %arg7[%c16, %c0_7] : memref<64x34xf32, #tpu.memory_space<vmem>>, vector<16x34xf32>
    %cst_8 = arith.constant dense<0.000000e+00> : vector<24x34xf32>
    %9 = tpu.matmul %4, %8, %cst_8 {dimension_numbers = #tpu.dot_dimension_numbers<[1], [0], [0], [1], [0, 0, 1, 1], [], []>} : vector<24x16xf32>, vector<16x34xf32>, vector<24x34xf32> -> vector<24x34xf32>
    %c24 = arith.constant 24 : index
    %c0_9 = arith.constant 0 : index
    %10 = vector.load %arg8[%c24, %c0_9] : memref<96x34xf32, #tpu.memory_space<vmem>>, vector<24x34xf32>
    tpu.vector_store %arg8[%c24, %c0_9], %9 {strides = array<i32>} : memref<96x34xf32, #tpu.memory_space<vmem>>, vector<24x34xf32>,
    %c32 = arith.constant 32 : index
    %c0_10 = arith.constant 0 : index
    %11 = vector.load %arg7[%c32, %c0_10] : memref<64x34xf32, #tpu.memory_space<vmem>>, vector<16x34xf32>
    %cst_11 = arith.constant dense<0.000000e+00> : vector<24x34xf32>
    %12 = tpu.matmul %4, %11, %cst_11 {dimension_numbers = #tpu.dot_dimension_numbers<[1], [0], [0], [1], [0, 0, 1, 1], [], []>} : vector<24x16xf32>, vector<16x34xf32>, vector<24x34xf32> -> vector<24x34xf32>
    %c48 = arith.constant 48 : index
    %c0_12 = arith.constant 0 : index
    %13 = vector.load %arg8[%c48, %c0_12] : memref<96x34xf32, #tpu.memory_space<vmem>>, vector<24x34xf32>
    tpu.vector_store %arg8[%c48, %c0_12], %12 {strides = array<i32>} : memref<96x34xf32, #tpu.memory_space<vmem>>, vector<24x34xf32>,
    %c48_13 = arith.constant 48 : index
    %c0_14 = arith.constant 0 : index
    %14 = vector.load %arg7[%c48_13, %c0_14] : memref<64x34xf32, #tpu.memory_space<vmem>>, vector<16x34xf32>
    %cst_15 = arith.constant dense<0.000000e+00> : vector<24x34xf32>
    %15 = tpu.matmul %4, %14, %cst_15 {dimension_numbers = #tpu.dot_dimension_numbers<[1], [0], [0], [1], [0, 0, 1, 1], [], []>} : vector<24x16xf32>, vector<16x34xf32>, vector<24x34xf32> -> vector<24x34xf32>
    %c72 = arith.constant 72 : index
    %c0_16 = arith.constant 0 : index
    %16 = vector.load %arg8[%c72, %c0_16] : memref<96x34xf32, #tpu.memory_space<vmem>>, vector<24x34xf32>
    tpu.vector_store %arg8[%c72, %c0_16], %15 {strides = array<i32>} : memref<96x34xf32, #tpu.memory_space<vmem>>, vector<24x34xf32>,
    %c0_17 = arith.constant 0 : index
    %c0_18 = arith.constant 0 : index
    %17 = vector.load %arg8[%c0_17, %c0_18] : memref<96x34xf32, #tpu.memory_space<vmem>>, vector<96x34xf32>
    %18 = vector.extract_strided_slice %17 {offsets = [0, 0], sizes = [96, 32], strides = [1, 1]} : vector<96x34xf32> to vector<96x32xf32>
    %19 = vector.extract_strided_slice %17 {offsets = [0, 1], sizes = [96, 32], strides = [1, 1]} : vector<96x34xf32> to vector<96x32xf32>
    %20 = vector.extract_strided_slice %17 {offsets = [0, 2], sizes = [96, 32], strides = [1, 1]} : vector<96x34xf32> to vector<96x32xf32>
    %21 = tpu.concatenate %18, %19, %20 in 0 : vector<96x32xf32>, vector<96x32xf32>, vector<96x32xf32> -> vector<288x32xf32>
    %c0_19 = arith.constant 0 : index
    %c0_20 = arith.constant 0 : index
    %22 = vector.load %arg5[%c0_19, %c0_20] : memref<16x288xf32, #tpu.memory_space<vmem>>, vector<16x288xf32>
    %cst_21 = arith.constant dense<0.000000e+00> : vector<16x32xf32>
    %23 = tpu.matmul %22, %21, %cst_21 {dimension_numbers = #tpu.dot_dimension_numbers<[1], [0], [0], [1], [0, 0, 1, 1], [], []>} : vector<16x288xf32>, vector<288x32xf32>, vector<16x32xf32> -> vector<16x32xf32>
    %c0_22 = arith.constant 0 : index
    %c0_23 = arith.constant 0 : index
    %24 = vector.load %arg9[%c0_22, %c0_23] : memref<16x32xf32, #tpu.memory_space<vmem>>, vector<16x32xf32>
    %25 = arith.addf %24, %23 : vector<16x32xf32>
    %c0_24 = arith.constant 0 : index
    %c0_25 = arith.constant 0 : index
    %26 = vector.load %arg9[%c0_24, %c0_25] : memref<16x32xf32, #tpu.memory_space<vmem>>, vector<16x32xf32>
    tpu.vector_store %arg9[%c0_24, %c0_25], %25 {strides = array<i32>} : memref<16x32xf32, #tpu.memory_space<vmem>>, vector<16x32xf32>,
    %c0_26 = arith.constant 0 : index
    %c0_27 = arith.constant 0 : index
    %27 = vector.load %arg10[%c0_26, %c0_27] : memref<16x32xf32, #tpu.memory_space<vmem>>, vector<16x32xf32>
    %28 = arith.mulf %23, %23 : vector<16x32xf32>
    %29 = arith.addf %27, %28 : vector<16x32xf32>
    %c0_28 = arith.constant 0 : index
    %c0_29 = arith.constant 0 : index
    %30 = vector.load %arg10[%c0_28, %c0_29] : memref<16x32xf32, #tpu.memory_space<vmem>>, vector<16x32xf32>
    tpu.vector_store %arg10[%c0_28, %c0_29], %29 {strides = array<i32>} : memref<16x32xf32, #tpu.memory_space<vmem>>, vector<16x32xf32>,
    %c8_i32 = arith.constant 8 : i32
    %31 = arith.muli %arg1, %c8_i32 : i32
    %32 = tpu.assume_multiple %31, 8 : i32
    %33 = vector.extract_strided_slice %23 {offsets = [0, 0], sizes = [8, 32], strides = [1, 1]} : vector<16x32xf32> to vector<8x32xf32>
    %c0_30 = arith.constant 0 : index
    %c0_31 = arith.constant 0 : index
    %34 = arith.index_cast %32 : i32 to index
    %c0_32 = arith.constant 0 : index
    %35 = vector.load %arg6[%c0_30, %c0_31, %34, %c0_32] : memref<1x2x32x32xf32, #tpu.memory_space<vmem>>, vector<1x1x8x32xf32>
    %36 = vector.shape_cast %35 : vector<1x1x8x32xf32> to vector<8x32xf32>
    %37 = vector.shape_cast %33 : vector<8x32xf32> to vector<1x1x8x32xf32>
    tpu.vector_store %arg6[%c0_30, %c0_31, %34, %c0_32], %37 {strides = array<i32>} : memref<1x2x32x32xf32, #tpu.memory_space<vmem>>, vector<1x1x8x32xf32>,
    %38 = vector.extract_strided_slice %23 {offsets = [8, 0], sizes = [8, 32], strides = [1, 1]} : vector<16x32xf32> to vector<8x32xf32>
    %c0_33 = arith.constant 0 : index
    %c1 = arith.constant 1 : index
    %39 = arith.index_cast %32 : i32 to index
    %c0_34 = arith.constant 0 : index
    %40 = vector.load %arg6[%c0_33, %c1, %39, %c0_34] : memref<1x2x32x32xf32, #tpu.memory_space<vmem>>, vector<1x1x8x32xf32>
    %41 = vector.shape_cast %40 : vector<1x1x8x32xf32> to vector<8x32xf32>
    %42 = vector.shape_cast %38 : vector<8x32xf32> to vector<1x1x8x32xf32>
    tpu.vector_store %arg6[%c0_33, %c1, %39, %c0_34], %42 {strides = array<i32>} : memref<1x2x32x32xf32, #tpu.memory_space<vmem>>, vector<1x1x8x32xf32>,
    %c3_i32 = arith.constant 3 : i32
    %43 = arith.cmpi eq, %arg1, %c3_i32 : i32
    %44 = arith.extui %43 : i1 to i32
    %c0_i32_35 = arith.constant 0 : i32
    %45 = arith.cmpi ne, %44, %c0_i32_35 : i32
    scf.if %45 {
      %c0_36 = arith.constant 0 : index
      %c0_37 = arith.constant 0 : index
      %46 = vector.load %arg9[%c0_36, %c0_37] : memref<16x32xf32, #tpu.memory_space<vmem>>, vector<8x32xf32>
      %cst_38 = arith.constant dense<0.000000e+00> : vector<8xf32>
      %47 = vector.multi_reduction <add>, %46, %cst_38 [1] : vector<8x32xf32> to vector<8xf32>
      %48 = vector.shape_cast %47 : vector<8xf32> to vector<8x1xf32>
      %cst_39 = arith.constant dense<0.000000e+00> : vector<1xf32>
      %49 = vector.multi_reduction <add>, %48, %cst_39 [0] : vector<8x1xf32> to vector<1xf32>
      %50 = vector.shape_cast %49 : vector<1xf32> to vector<1x1xf32>
      %c0_40 = arith.constant 0 : index
      %c0_41 = arith.constant 0 : index
      %51 = vector.load %arg10[%c0_40, %c0_41] : memref<16x32xf32, #tpu.memory_space<vmem>>, vector<8x32xf32>
      %cst_42 = arith.constant dense<0.000000e+00> : vector<8xf32>
      %52 = vector.multi_reduction <add>, %51, %cst_42 [1] : vector<8x32xf32> to vector<8xf32>
      %53 = vector.shape_cast %52 : vector<8xf32> to vector<8x1xf32>
      %cst_43 = arith.constant dense<0.000000e+00> : vector<1xf32>
      %54 = vector.multi_reduction <add>, %53, %cst_43 [0] : vector<8x1xf32> to vector<1xf32>
      %55 = vector.shape_cast %54 : vector<1xf32> to vector<1x1xf32>
      %cst_44 = arith.constant 9.765625E-4 : f32
      %56 = vector.broadcast %cst_44 : f32 to vector<1x1xf32>
      %57 = arith.mulf %50, %56 : vector<1x1xf32>
      %cst_45 = arith.constant 9.765625E-4 : f32
      %58 = vector.broadcast %cst_45 : f32 to vector<1x1xf32>
      %59 = arith.mulf %55, %58 : vector<1x1xf32>
      %60 = arith.mulf %57, %57 : vector<1x1xf32>
      %61 = arith.subf %59, %60 : vector<1x1xf32>
      %cst_46 = arith.constant 0.000000e+00 : f32
      %62 = vector.broadcast %cst_46 : f32 to vector<1x1xf32>
      %63 = arith.maximumf %61, %62 : vector<1x1xf32>
      %cst_47 = arith.constant 9.99999974E-6 : f32
      %64 = vector.broadcast %cst_47 : f32 to vector<1x1xf32>
      %65 = arith.addf %63, %64 : vector<1x1xf32>
      %66 = math.rsqrt %65 : vector<1x1xf32>
      %c0_48 = arith.constant 0 : index
      %c0_49 = arith.constant 0 : index
      %c0_50 = arith.constant 0 : index
      %c0_51 = arith.constant 0 : index
      %67 = vector.load %arg6[%c0_48, %c0_49, %c0_50, %c0_51] : memref<1x2x32x32xf32, #tpu.memory_space<vmem>>, vector<1x1x32x32xf32>
      %68 = vector.shape_cast %67 : vector<1x1x32x32xf32> to vector<32x32xf32>
      %69 = vector.broadcast %57 : vector<1x1xf32> to vector<32x32xf32>
      %70 = arith.subf %68, %69 : vector<32x32xf32>
      %71 = vector.broadcast %66 : vector<1x1xf32> to vector<32x32xf32>
      %72 = arith.mulf %70, %71 : vector<32x32xf32>
      %cst_52 = arith.constant 5.000000e-01 : f32
      %73 = vector.broadcast %cst_52 : f32 to vector<32x32xf32>
      %74 = arith.mulf %73, %72 : vector<32x32xf32>
      %cst_53 = arith.constant 0.707106769 : f32
      %75 = vector.broadcast %cst_53 : f32 to vector<32x32xf32>
      %76 = arith.mulf %72, %75 : vector<32x32xf32>
      %cst_54 = arith.constant 0.000000e+00 : f32
      %77 = vector.broadcast %cst_54 : f32 to vector<32x32xf32>
      %78 = arith.cmpf olt, %76, %77 : vector<32x32xf32>
      %cst_55 = arith.constant -1.000000e+00 : f32
      %cst_56 = arith.constant 1.000000e+00 : f32
      %79 = vector.broadcast %cst_55 : f32 to vector<32x32xf32>
      %80 = vector.broadcast %cst_56 : f32 to vector<32x32xf32>
      %81 = arith.select %78, %79, %80 : vector<32x32xi1>, vector<32x32xf32>
      %82 = math.absf %76 : vector<32x32xf32>
      %cst_57 = arith.constant 0.327591091 : f32
      %83 = vector.broadcast %cst_57 : f32 to vector<32x32xf32>
      %84 = arith.mulf %83, %82 : vector<32x32xf32>
      %cst_58 = arith.constant 1.000000e+00 : f32
      %85 = vector.broadcast %cst_58 : f32 to vector<32x32xf32>
      %86 = arith.addf %85, %84 : vector<32x32xf32>
      %87 = tpu.reciprocal %86 : vector<32x32xf32> -> vector<32x32xf32>
      %cst_59 = arith.constant 1.06140542 : f32
      %88 = vector.broadcast %cst_59 : f32 to vector<32x32xf32>
      %89 = arith.mulf %87, %88 : vector<32x32xf32>
      %cst_60 = arith.constant -1.45315206 : f32
      %90 = vector.broadcast %cst_60 : f32 to vector<32x32xf32>
      %91 = arith.addf %90, %89 : vector<32x32xf32>
      %92 = arith.mulf %87, %91 : vector<32x32xf32>
      %cst_61 = arith.constant 1.42141378 : f32
      %93 = vector.broadcast %cst_61 : f32 to vector<32x32xf32>
      %94 = arith.addf %93, %92 : vector<32x32xf32>
      %95 = arith.mulf %87, %94 : vector<32x32xf32>
      %cst_62 = arith.constant -0.284496725 : f32
      %96 = vector.broadcast %cst_62 : f32 to vector<32x32xf32>
      %97 = arith.addf %96, %95 : vector<32x32xf32>
      %98 = arith.mulf %87, %97 : vector<32x32xf32>
      %cst_63 = arith.constant 0.254829586 : f32
      %99 = vector.broadcast %cst_63 : f32 to vector<32x32xf32>
      %100 = arith.addf %99, %98 : vector<32x32xf32>
      %101 = arith.mulf %87, %100 : vector<32x32xf32>
      %cst_64 = arith.constant 0.000000e+00 : f32
      %102 = vector.broadcast %cst_64 : f32 to vector<32x32xf32>
      %103 = arith.subf %102, %82 : vector<32x32xf32>
      %104 = arith.mulf %103, %82 : vector<32x32xf32>
      %105 = math.exp %104 : vector<32x32xf32>
      %106 = arith.mulf %101, %105 : vector<32x32xf32>
      %cst_65 = arith.constant 1.000000e+00 : f32
      %107 = vector.broadcast %cst_65 : f32 to vector<32x32xf32>
      %108 = arith.subf %107, %106 : vector<32x32xf32>
      %109 = arith.mulf %81, %108 : vector<32x32xf32>
      %cst_66 = arith.constant 1.000000e+00 : f32
      %110 = vector.broadcast %cst_66 : f32 to vector<32x32xf32>
      %111 = arith.addf %110, %109 : vector<32x32xf32>
      %112 = arith.mulf %74, %111 : vector<32x32xf32>
      %c0_67 = arith.constant 0 : index
      %c0_68 = arith.constant 0 : index
      %c0_69 = arith.constant 0 : index
      %c0_70 = arith.constant 0 : index
      %113 = vector.load %arg6[%c0_67, %c0_68, %c0_69, %c0_70] : memref<1x2x32x32xf32, #tpu.memory_space<vmem>>, vector<1x1x32x32xf32>
      %114 = vector.shape_cast %113 : vector<1x1x32x32xf32> to vector<32x32xf32>
      %115 = vector.shape_cast %112 : vector<32x32xf32> to vector<1x1x32x32xf32>
      tpu.vector_store %arg6[%c0_67, %c0_68, %c0_69, %c0_70], %115 {strides = array<i32>} : memref<1x2x32x32xf32, #tpu.memory_space<vmem>>, vector<1x1x32x32xf32>,
      %c8 = arith.constant 8 : index
      %c0_71 = arith.constant 0 : index
      %116 = vector.load %arg9[%c8, %c0_71] : memref<16x32xf32, #tpu.memory_space<vmem>>, vector<8x32xf32>
      %cst_72 = arith.constant dense<0.000000e+00> : vector<8xf32>
      %117 = vector.multi_reduction <add>, %116, %cst_72 [1] : vector<8x32xf32> to vector<8xf32>
      %118 = vector.shape_cast %117 : vector<8xf32> to vector<8x1xf32>
      %cst_73 = arith.constant dense<0.000000e+00> : vector<1xf32>
      %119 = vector.multi_reduction <add>, %118, %cst_73 [0] : vector<8x1xf32> to vector<1xf32>
      %120 = vector.shape_cast %119 : vector<1xf32> to vector<1x1xf32>
      %c8_74 = arith.constant 8 : index
      %c0_75 = arith.constant 0 : index
      %121 = vector.load %arg10[%c8_74, %c0_75] : memref<16x32xf32, #tpu.memory_space<vmem>>, vector<8x32xf32>
      %cst_76 = arith.constant dense<0.000000e+00> : vector<8xf32>
      %122 = vector.multi_reduction <add>, %121, %cst_76 [1] : vector<8x32xf32> to vector<8xf32>
      %123 = vector.shape_cast %122 : vector<8xf32> to vector<8x1xf32>
      %cst_77 = arith.constant dense<0.000000e+00> : vector<1xf32>
      %124 = vector.multi_reduction <add>, %123, %cst_77 [0] : vector<8x1xf32> to vector<1xf32>
      %125 = vector.shape_cast %124 : vector<1xf32> to vector<1x1xf32>
      %cst_78 = arith.constant 9.765625E-4 : f32
      %126 = vector.broadcast %cst_78 : f32 to vector<1x1xf32>
      %127 = arith.mulf %120, %126 : vector<1x1xf32>
      %cst_79 = arith.constant 9.765625E-4 : f32
      %128 = vector.broadcast %cst_79 : f32 to vector<1x1xf32>
      %129 = arith.mulf %125, %128 : vector<1x1xf32>
      %130 = arith.mulf %127, %127 : vector<1x1xf32>
      %131 = arith.subf %129, %130 : vector<1x1xf32>
      %cst_80 = arith.constant 0.000000e+00 : f32
      %132 = vector.broadcast %cst_80 : f32 to vector<1x1xf32>
      %133 = arith.maximumf %131, %132 : vector<1x1xf32>
      %cst_81 = arith.constant 9.99999974E-6 : f32
      %134 = vector.broadcast %cst_81 : f32 to vector<1x1xf32>
      %135 = arith.addf %133, %134 : vector<1x1xf32>
      %136 = math.rsqrt %135 : vector<1x1xf32>
      %c0_82 = arith.constant 0 : index
      %c1_83 = arith.constant 1 : index
      %c0_84 = arith.constant 0 : index
      %c0_85 = arith.constant 0 : index
      %137 = vector.load %arg6[%c0_82, %c1_83, %c0_84, %c0_85] : memref<1x2x32x32xf32, #tpu.memory_space<vmem>>, vector<1x1x32x32xf32>
      %138 = vector.shape_cast %137 : vector<1x1x32x32xf32> to vector<32x32xf32>
      %139 = vector.broadcast %127 : vector<1x1xf32> to vector<32x32xf32>
      %140 = arith.subf %138, %139 : vector<32x32xf32>
      %141 = vector.broadcast %136 : vector<1x1xf32> to vector<32x32xf32>
      %142 = arith.mulf %140, %141 : vector<32x32xf32>
      %cst_86 = arith.constant 5.000000e-01 : f32
      %143 = vector.broadcast %cst_86 : f32 to vector<32x32xf32>
      %144 = arith.mulf %143, %142 : vector<32x32xf32>
      %cst_87 = arith.constant 0.707106769 : f32
      %145 = vector.broadcast %cst_87 : f32 to vector<32x32xf32>
      %146 = arith.mulf %142, %145 : vector<32x32xf32>
      %cst_88 = arith.constant 0.000000e+00 : f32
      %147 = vector.broadcast %cst_88 : f32 to vector<32x32xf32>
      %148 = arith.cmpf olt, %146, %147 : vector<32x32xf32>
      %cst_89 = arith.constant -1.000000e+00 : f32
      %cst_90 = arith.constant 1.000000e+00 : f32
      %149 = vector.broadcast %cst_89 : f32 to vector<32x32xf32>
      %150 = vector.broadcast %cst_90 : f32 to vector<32x32xf32>
      %151 = arith.select %148, %149, %150 : vector<32x32xi1>, vector<32x32xf32>
      %152 = math.absf %146 : vector<32x32xf32>
      %cst_91 = arith.constant 0.327591091 : f32
      %153 = vector.broadcast %cst_91 : f32 to vector<32x32xf32>
      %154 = arith.mulf %153, %152 : vector<32x32xf32>
      %cst_92 = arith.constant 1.000000e+00 : f32
      %155 = vector.broadcast %cst_92 : f32 to vector<32x32xf32>
      %156 = arith.addf %155, %154 : vector<32x32xf32>
      %157 = tpu.reciprocal %156 : vector<32x32xf32> -> vector<32x32xf32>
      %cst_93 = arith.constant 1.06140542 : f32
      %158 = vector.broadcast %cst_93 : f32 to vector<32x32xf32>
      %159 = arith.mulf %157, %158 : vector<32x32xf32>
      %cst_94 = arith.constant -1.45315206 : f32
      %160 = vector.broadcast %cst_94 : f32 to vector<32x32xf32>
      %161 = arith.addf %160, %159 : vector<32x32xf32>
      %162 = arith.mulf %157, %161 : vector<32x32xf32>
      %cst_95 = arith.constant 1.42141378 : f32
      %163 = vector.broadcast %cst_95 : f32 to vector<32x32xf32>
      %164 = arith.addf %163, %162 : vector<32x32xf32>
      %165 = arith.mulf %157, %164 : vector<32x32xf32>
      %cst_96 = arith.constant -0.284496725 : f32
      %166 = vector.broadcast %cst_96 : f32 to vector<32x32xf32>
      %167 = arith.addf %166, %165 : vector<32x32xf32>
      %168 = arith.mulf %157, %167 : vector<32x32xf32>
      %cst_97 = arith.constant 0.254829586 : f32
      %169 = vector.broadcast %cst_97 : f32 to vector<32x32xf32>
      %170 = arith.addf %169, %168 : vector<32x32xf32>
      %171 = arith.mulf %157, %170 : vector<32x32xf32>
      %cst_98 = arith.constant 0.000000e+00 : f32
      %172 = vector.broadcast %cst_98 : f32 to vector<32x32xf32>
      %173 = arith.subf %172, %152 : vector<32x32xf32>
      %174 = arith.mulf %173, %152 : vector<32x32xf32>
      %175 = math.exp %174 : vector<32x32xf32>
      %176 = arith.mulf %171, %175 : vector<32x32xf32>
      %cst_99 = arith.constant 1.000000e+00 : f32
      %177 = vector.broadcast %cst_99 : f32 to vector<32x32xf32>
      %178 = arith.subf %177, %176 : vector<32x32xf32>
      %179 = arith.mulf %151, %178 : vector<32x32xf32>
      %cst_100 = arith.constant 1.000000e+00 : f32
      %180 = vector.broadcast %cst_100 : f32 to vector<32x32xf32>
      %181 = arith.addf %180, %179 : vector<32x32xf32>
      %182 = arith.mulf %144, %181 : vector<32x32xf32>
      %c0_101 = arith.constant 0 : index
      %c1_102 = arith.constant 1 : index
      %c0_103 = arith.constant 0 : index
      %c0_104 = arith.constant 0 : index
      %183 = vector.load %arg6[%c0_101, %c1_102, %c0_103, %c0_104] : memref<1x2x32x32xf32, #tpu.memory_space<vmem>>, vector<1x1x32x32xf32>
      %184 = vector.shape_cast %183 : vector<1x1x32x32xf32> to vector<32x32xf32>
      %185 = vector.shape_cast %182 : vector<32x32xf32> to vector<1x1x32x32xf32>
      tpu.vector_store %arg6[%c0_101, %c1_102, %c0_103, %c0_104], %185 {strides = array<i32>} : memref<1x2x32x32xf32, #tpu.memory_space<vmem>>, vector<1x1x32x32xf32>,
    } else {
    }
    return
  }
  func.func @transform_0(%arg0: i32, %arg1: i32) -> (i32, i32, i32) {
    %c0_i32 = arith.constant 0 : i32
    %c0_i32_0 = arith.constant 0 : i32
    %c0_i32_1 = arith.constant 0 : i32
    return %arg0, %c0_i32, %c0_i32_0 : i32, i32, i32
  }
  func.func @transform_1(%arg0: i32, %arg1: i32) -> (i32, i32, i32) {
    %c0_i32 = arith.constant 0 : i32
    %c0_i32_0 = arith.constant 0 : i32
    %c0_i32_1 = arith.constant 0 : i32
    return %arg1, %c0_i32, %c0_i32_0 : i32, i32, i32
  }
  func.func @transform_2(%arg0: i32, %arg1: i32) -> (i32, i32) {
    %c0_i32 = arith.constant 0 : i32
    %c0_i32_0 = arith.constant 0 : i32
    %c0_i32_1 = arith.constant 0 : i32
    return %c0_i32, %c0_i32_0 : i32, i32
  }
  func.func @transform_3(%arg0: i32, %arg1: i32) -> (i32, i32) {
    %c0_i32 = arith.constant 0 : i32
    %c0_i32_0 = arith.constant 0 : i32
    %c0_i32_1 = arith.constant 0 : i32
    return %c0_i32, %c0_i32_0 : i32, i32
  }
  func.func @transform_4(%arg0: i32, %arg1: i32) -> (i32, i32, i32, i32) {
    %c0_i32 = arith.constant 0 : i32
    %c0_i32_0 = arith.constant 0 : i32
    %c0_i32_1 = arith.constant 0 : i32
    %c0_i32_2 = arith.constant 0 : i32
    return %arg0, %c0_i32, %c0_i32_0, %c0_i32_1 : i32, i32, i32, i32
  }
}

</mosaic_0001>

<bundles_post_ra>
// kernel: tpu_custom_call.1
= control target key start
LH: loop header
LB: loop body
LE: loop exit
PB: predicated region body
PF: predicated region fallthrough
CT: control target
= control target key end

     0   :  { %9 = vsyncpa [#allocation7], 0  ;;  %s2337_s0 = inlined_call_operand.vmem [shape: f32[2,64,16], index: 0, kind: input, shape index: {}]   ;;  %s2338_s1 = inlined_call_operand.vmem [shape: f32[4,24,16], index: 1, kind: input, shape index: {}]   ;;  %s2339_s2 = inlined_call_operand.vmem [shape: f32[16,34], index: 2, kind: input, shape index: {}]   ;;  %s2340_s3 = inlined_call_operand.vmem [shape: f32[16,288], index: 3, kind: input, shape index: {}]   ;;  %s2341_s4 = inlined_call_operand.hbm [shape: f32[2,2,32,32], index: 4, kind: output, shape index: {}]  }
   0x1   :  { %11 = vsyncpa [#allocation7 + $0x1], 0  ;;  %s1874_s15 = smov 0   ;;  %s1876_s16 = smov 0  }
   0x2   :  { %s1878_s17 = smov 0   ;;  %s1880_s18 = smov 0  }
   0x3   :  { %s1882_s19 = smov 0   ;;  %s1884_s20 = smov 0  }
   0x4   :  { %s1886_s21 = smov 0   ;;  %s1888_s22 = smov 0  }
   0x5 LB: > { %s1422_s23 = sadd.s32 4294967295, %s1838_s22   ;;  %s1423_s24 = sadd.s32 4294967294, %s1838_s22   ;;  %s1838_s22 = sphi %s1888_s22, %s17_s22   ;;  %s1834_s21 = sphi %s1886_s21, %s2357_s21   ;;  %s1830_s20 = sphi %s1884_s20, %s2356_s20   ;;  %s1826_s19 = sphi %s1882_s19, %s2355_s19   ;;  %s1822_s18 = sphi %s1880_s18, %s2354_s18   ;;  %s1818_s17 = sphi %s1878_s17, %s2353_s17   ;;  %s1814_s16 = sphi %s1876_s16, %s2352_s16   ;;  %s1810_s15 = sphi %s1874_s15, %s2351_s15  }
   0x6   : > { %s26_s25 = sadd.s32 1, %s1830_s20  ;;  %s29_s26 = sadd.s32 1, %s1834_s21 }
   0x7   : > { %p27_p0 = scmp.ge.s32.totalorder %s26_s25, 4  ;;  %p140_p1 = scmp.ne.s32.totalorder %s1818_s17, %s1814_s16 }
   0x8   : > { %p141_p2 = scmp.eq.s32.totalorder %s1422_s23, 7  ;;  %p146_p4 = scmp.ne.s32.totalorder %s1814_s16, %s1810_s15 }
   0x9   : > { %s2359_s25 = smov (%p27_p0, %s26_s25), 0  ;;  %s2361_s26 = smov (!%p27_p0, %s29_s26), %s1834_s21 }
   0xa   : > { %2344 = sst [smem:[#allocation9_spill]] %s2359_s25  ;;  %p1923_p3 = por %p141_p2, %p140_p1 }
   0xb   : > { %p31_p5 = scmp.ge.s32.totalorder %s2361_s26, 2  ;;  %p147_p6 = scmp.eq.s32.totalorder %s1423_s24, 7 }
   0xc   : > { %p1426_p7 = scmp.ge.s32.totalorder %s1838_s22, 1  ;;  %p187_p8 = scmp.lt.s32.totalorder %s1838_s22, 9 }
   0xd   : > { %s2363_s26 = smov (%p31_p5, %s2361_s26), 0  ;;  %p1933_p9 = por %p147_p6, %p146_p4 }
   0xe   : > { %2346 = sst [smem:[#allocation10_spill]] %s2363_s26  ;;  %p188_p10 = pnand %p1426_p7, %p187_p8 }
   0xf   : > { %s127_s29 = ssub.s32 %s1834_s21, %s2363_s26  ;;  %s130_s30 = sadd.s32 1, %s1818_s17 }
  0x10   : > { %p128_p11 = scmp.eq.s32.totalorder %s127_s29, 0  ;;  %191 = sbr.rel (%p188_p10) target bundleno = 1085 (0x43d), region = 36 }
  0x11   : > { %s2342_s6 = sand.u32 (!%p188_p10), 1, %s1814_s16   ;;  %p218_p12 = scmp.lt.s32.totalorder (!%p188_p10), %s1826_s19, 1 }
  0x12   : > { %s1941_s5 = scalar_select %p128_p11, %s1818_s17, %s130_s30  }
  0x13   : > { %s1427_s7 = sshll.u32 (!%p188_p10), %s2342_s6, 6  ;;  %p223_p13 = scmp.lt.s32.totalorder (!%p188_p10), %s1822_s18, 3 }
  0x14   : > { %s1958_s30 = scalar_lea.vmem (!%p188_p10), [#allocation6], %s1427_s7  ;;  %p1431_p0 = scmp.ne.s32.totalorder (!%p188_p10), %s1822_s18, 0 }
  0x15   : > { %s219_s8 = scalar_select %p218_p12, %s1826_s19, 1 }
  0x16   : > { %s224_s9 = scalar_select %p223_p13, %s1822_s18, 3 }
  0x17   : > { %s1471_s10 = sshll.u32 %s219_s8, 6  ;;  %231 = sbr.rel (%p1431_p0) target bundleno = 234 (0xea), region = 40 }
  0x18   : > { %s222_s13 = scalar_lea.vmem %s2337_s0, %s1471_s10  ;;  %s1630_s14 = smul.u32 24, %s224_s9 }
  0x1a   : > { %s1956_s29 = scalar_lea.vmem %s2338_s1, %s1630_s14 }
  0x1c   : > { %v241_v0 = vld [vmem:[%s2339_s2 + $0x8] sm:$0xff]  ;;  %v240_v1 = vld [vmem:[%s2339_s2] sm:$0xff]  ;;  %vm242_vm0 = vcmask 130048   ;;  %v234_v6 = vld [vmem:[%s222_s13 + $0x10] sm:$0xff]  ;;  %vm381_vm1 = vcmask 261120   ;;  %v1840_v10 = vmov 0.0  }
  0x1d   : > { %1547 = vmatprep.subr.mxu0 %v241_v0  ;;  %1626 = vmatprep.subr.mxu1 %v241_v0  ;;  %v232_v2 = vld [vmem:[%s222_s13] sm:$0xff]  ;;  %v233_v4 = vld [vmem:[%s222_s13 + $0x8] sm:$0xff]  ;;  %v238_v7 = vld [vmem:[%s222_s13 + $0x30] sm:$0xff]  ;;  %382 = vst.msk [vmem:[#allocation4] sm:$0xff] %vm381_vm1, %v1840_v10  ;;  %vm372_vm2 = vcmask 277504  }
  0x1e   : > { %1548 = vmatpush3.msra.mxu0 %v241_v0  ;;  %1628 = vmatpush3.msra.mxu1 %v241_v0  ;;  %v236_v3 = vld [vmem:[%s222_s13 + $0x20] sm:$0xff]  ;;  %v237_v5 = vld [vmem:[%s222_s13 + $0x28] sm:$0xff]  ;;  %v235_v8 = vld [vmem:[%s222_s13 + $0x18] sm:$0xff]  ;;  %383 = vst.msk [vmem:[#allocation4 + $0x8] sm:$0xff] %vm381_vm1, %v1840_v10 }
  0x1f   : > { %1549 = vmatprep.subr.mxu0 %v240_v1  ;;  %1627 = vmatprep.subr.mxu1 %v240_v1  ;;  %v239_v9 = vld [vmem:[%s222_s13 + $0x38] sm:$0xff]  ;;  %384 = vst.msk [vmem:[#allocation5] sm:$0xff] %vm381_vm1, %v1840_v10  ;;  %385 = vst.msk [vmem:[#allocation5 + $0x8] sm:$0xff] %vm381_vm1, %v1840_v10 }
  0x20   : > { %1550 = vmatpush3.msra.mxu0 %v240_v1  ;;  %1629 = vmatpush3.msra.mxu1 %v240_v1 }
  0x21   : > { %1551 = vmatprep.mubr.msk.f32.mxu0 %vm242_vm0, %v232_v2  ;;  %1557 = vmatprep.mubr.msk.f32.mxu1 %vm242_vm0, %v236_v3 }
  0x22   : > { %1552 = vmatmul.mubr.msk.f32.vlgmr.msra.gmra.mxu0 %vm242_vm0, %v233_v4  ;;  %1558 = vmatmul.mubr.msk.f32.vlgmr.msra.gmra.mxu1 %vm242_vm0, %v237_v5 }
  0x23   : > { %1554 = vmatprep.mubr.msk.f32.mxu0 %vm242_vm0, %v234_v6  ;;  %1560 = vmatprep.mubr.msk.f32.mxu1 %vm242_vm0, %v238_v7 }
  0x26   : > { %1555 = vmatmul.mubr.msk.f32.gmra.mxu0 %vm242_vm0, %v235_v8  ;;  %1561 = vmatmul.mubr.msk.f32.gmra.mxu1 %vm242_vm0, %v239_v9 }
  0xe2   : > { %v1553_v11 = vpop.f32.mrf.mxu0  ;;  %v1559_v12 = vpop.f32.mrf.mxu1 }
  0xe3   : > { %374 = vst.msk [vmem:[#allocation2 + $0x8] sm:$0xff] %vm372_vm2, %v1553_v11  ;;  %378 = vst.msk [vmem:[#allocation2 + $0x28] sm:$0xff] %vm372_vm2, %v1559_v12 }
  0xe4   : > { %v333_v13 = vpop.f32.mrf.mxu0  ;;  %v353_v14 = vpop.f32.mrf.mxu1 }
  0xe5   : > { %373 = vst.msk [vmem:[#allocation2] sm:$0xff] %vm372_vm2, %v333_v13  ;;  %377 = vst.msk [vmem:[#allocation2 + $0x20] sm:$0xff] %vm372_vm2, %v353_v14 }
  0xe6   : > { %v1556_v15 = vpop.f32.mrf.mxu0  ;;  %v1562_v16 = vpop.f32.mrf.mxu1 }
  0xe7   : > { %376 = vst.msk [vmem:[#allocation2 + $0x18] sm:$0xff] %vm372_vm2, %v1556_v15  ;;  %380 = vst.msk [vmem:[#allocation2 + $0x38] sm:$0xff] %vm372_vm2, %v1562_v16 }
  0xe8   : > { %v343_v17 = vpop.f32.mrf.mxu0  ;;  %v363_v18 = vpop.f32.mrf.mxu1 }
  0xe9   : > { %375 = vst.msk [vmem:[#allocation2 + $0x10] sm:$0xff] %vm372_vm2, %v343_v17  ;;  %379 = vst.msk [vmem:[#allocation2 + $0x30] sm:$0xff] %vm372_vm2, %v363_v18 }
  0xea PF: > { %v390_v19 = vld [vmem:[#allocation2 + $0x8] sm:$0xff]  ;;  %v1841_v21 = vmov 0.0   ;;  %v386_v24 = vld [vmem:[%s1956_s29] sm:$0xff]  ;;  %vm391_vm3 = vcmask 130048   ;;  %vm1842_vm4 = vmmov 0   ;;  %v388_v28 = vld [vmem:[%s1956_s29 + $0x10] sm:$0xff] }
  0xeb   : > { %v571_v20 = vld [vmem:[#allocation2 + $0x28] sm:$0xff]  ;;  %1563 = vmatprep.subr.mxu1 %v1841_v21  ;;  %1589 = vmatprep.subr.mxu0 %v1841_v21  ;;  %vm481_vm5 = vcmask 277504   ;;  %s1843_s25 = smov 126   ;;  %s1844_s26 = smov 127   ;;  %v838_v4 = vld [vmem:[%s2340_s3 + $0x10] sm:$0xff]  ;;  %vm842_vm6 = vcmask 261120  }
  0xec   : > { %v389_v22 = vld [vmem:[#allocation2] sm:$0xff]  ;;  %1564 = vmatpush3.msra.mxu1 %v390_v19  ;;  %1590 = vmatpush3.msra.mxu0 %v571_v20  ;;  %v387_v26 = vld [vmem:[%s1956_s29 + $0x8] sm:$0xff]  ;;  %p1457_p1 = scmp.ne.s32.totalorder %s1822_s18, 3 }
  0xed   : > { %v570_v23 = vld [vmem:[#allocation2 + $0x20] sm:$0xff]  ;;  %1565 = vmatprep.subr.mxu1 %v1841_v21  ;;  %1591 = vmatprep.subr.mxu0 %v1841_v21  ;;  %v837_v2 = vld [vmem:[%s2340_s3 + $0x8] sm:$0xff] }
  0xee   : > { %1566 = vmatpush3.msra.mxu1 %v389_v22  ;;  %1567 = vmatprep.mubr.msk.f32.mxu1 %vm1842_vm4, %v1841_v21  ;;  %v486_v25 = vld [vmem:[#allocation2 + $0x18] sm:$0xff] }
  0xef   : > { %1592 = vmatpush3.msra.mxu0 %v570_v23  ;;  %1593 = vmatprep.mubr.msk.f32.mxu0 %vm1842_vm4, %v1841_v21  ;;  %v656_v29 = vld [vmem:[#allocation2 + $0x38] sm:$0xff] }
  0xf0   : > { %1568 = vmatmul.mubr.msk.f32.vlgmr.msra.gmra.mxu1 %vm391_vm3, %v386_v24  ;;  %1594 = vmatmul.mubr.msk.f32.vlgmr.msra.gmra.mxu0 %vm391_vm3, %v386_v24  ;;  %v485_v27 = vld [vmem:[#allocation2 + $0x10] sm:$0xff] }
  0xf1   : > { %1570 = vmatprep.mubr.msk.f32.mxu1 %vm1842_vm4, %v1841_v21  ;;  %1576 = vmatprep.subr.mxu1 %v1841_v21  ;;  %v655_v30 = vld [vmem:[#allocation2 + $0x30] sm:$0xff] }
  0xf2   : > { %1577 = vmatpush3.msra.mxu1 %v486_v25  ;;  %1596 = vmatprep.mubr.msk.f32.mxu0 %vm1842_vm4, %v1841_v21  ;;  %v836_v25 = vld [vmem:[%s2340_s3] sm:$0xff] }
  0xf3   : > { %1578 = vmatprep.subr.mxu1 %v1841_v21 }
  0xf4   : > { %1571 = vmatmul.mubr.msk.f32.gmra.mxu1 %vm391_vm3, %v387_v26  ;;  %1597 = vmatmul.mubr.msk.f32.gmra.mxu0 %vm391_vm3, %v387_v26 }
  0xf5   : > { %1573 = vmatprep.mubr.msk.f32.mxu1 %vm1842_vm4, %v1841_v21  ;;  %1579 = vmatpush3.msra.mxu1 %v485_v27 }
  0xf6   : > { %1602 = vmatprep.subr.mxu1 %v1841_v21  ;;  %1599 = vmatprep.mubr.msk.f32.mxu0 %vm1842_vm4, %v1841_v21 }
  0xf8   : > { %1574 = vmatmul.mubr.msk.f32.gmra.mxu1 %vm391_vm3, %v388_v28  ;;  %1600 = vmatmul.mubr.msk.f32.gmra.mxu0 %vm391_vm3, %v388_v28 }
  0xf9   : > { %1580 = vmatprep.mubr.msk.f32.mxu1 %vm1842_vm4, %v1841_v21  ;;  %913 = vmatprep.mubr.f32.mxu0 %v837_v2 }
  0xfc   : > { %1581 = vmatmul.mubr.msk.f32.vlgmr.msra.gmra.mxu1 %vm391_vm3, %v386_v24 }
  0xfd   : > { %1583 = vmatprep.mubr.msk.f32.mxu1 %vm1842_vm4, %v1841_v21  ;;  %1603 = vmatpush3.msra.mxu1 %v656_v29  ;;  %v839_v29 = vld [vmem:[%s2340_s3 + $0x18] sm:$0xff] }
  0xfe   : > { %1604 = vmatprep.subr.mxu1 %v1841_v21 }
  0xff   : > { %1605 = vmatpush3.msra.mxu1 %v655_v30 }
 0x100   : > { %1584 = vmatmul.mubr.msk.f32.gmra.mxu1 %vm391_vm3, %v387_v26 }
 0x101   : > { %1586 = vmatprep.mubr.msk.f32.mxu1 %vm1842_vm4, %v1841_v21 }
 0x104   : > { %1587 = vmatmul.mubr.msk.f32.gmra.mxu1 %vm391_vm3, %v388_v28 }
 0x105   : > { %1606 = vmatprep.mubr.msk.f32.mxu1 %vm1842_vm4, %v1841_v21 }
 0x108   : > { %1607 = vmatmul.mubr.msk.f32.vlgmr.msra.gmra.mxu1 %vm391_vm3, %v386_v24 }
 0x109   : > { %1609 = vmatprep.mubr.msk.f32.mxu1 %vm1842_vm4, %v1841_v21 }
 0x10c   : > { %1610 = vmatmul.mubr.msk.f32.gmra.mxu1 %vm391_vm3, %v387_v26  ;;  %v840_v26 = vld [vmem:[%s2340_s3 + $0x20] sm:$0xff] }
 0x10d   : > { %1612 = vmatprep.mubr.msk.f32.mxu1 %vm1842_vm4, %v1841_v21 }
 0x110   : > { %1613 = vmatmul.mubr.msk.f32.gmra.mxu1 %vm391_vm3, %v388_v28 }
 0x111   : > { %1623 = vmatprep.mubr.msk.f32.mxu1 %vm842_vm6, %v838_v4 }
 0x1b0   : > { %v467_v31 = vpop.f32.mrf.mxu1  ;;  %v638_v32 = vpop.f32.mrf.mxu0 }
 0x1b1   : > { %482 = vst.msk [vmem:[#allocation3] sm:$0xff] %vm481_vm5, %v467_v31  ;;  %652 = vst.msk [vmem:[#allocation3 + $0x30] sm:$0xff] %vm481_vm5, %v638_v32  ;;  %v841_v32 = vld [vmem:[%s2340_s3 + $0x28] sm:$0xff] }
 0x1b2   : > { %v1569_v33 = vpop.f32.mrf.mxu1  ;;  %v1595_v34 = vpop.f32.mrf.mxu0 }
 0x1b4   : > { %v472_v35 = vpop.f32.mrf.mxu1  ;;  %v643_v36 = vpop.f32.mrf.mxu0 }
 0x1b5   : > { %483 = vst.msk [vmem:[#allocation3 + $0x8] sm:$0xff] %vm481_vm5, %v472_v35  ;;  %653 = vst.msk [vmem:[#allocation3 + $0x38] sm:$0xff] %vm481_vm5, %v643_v36 }
 0x1b6   : > { %v1572_v37 = vpop.f32.mrf.mxu1  ;;  %v1598_v38 = vpop.f32.mrf.mxu0 }
 0x1b8   : > { %v477_v39 = vpop.f32.mrf.mxu1  ;;  %v2014_v40 = vld [vmem:[#allocation3 + $0x30] sm:$0xff]  ;;  %v648_v41 = vpop.f32.mrf.mxu0  ;;  %v2034_v52 = vld [vmem:[#allocation3] sm:$0xff] }
 0x1b9   : > { %484 = vst.msk [vmem:[#allocation3 + $0x10] sm:$0xff] %vm481_vm5, %v477_v39  ;;  %812 = vrot.lane.b32.xlu1 %v2014_v40, %s1843_s25  ;;  %654 = vst.msk [vmem:[#allocation3 + $0x40] sm:$0xff] %vm481_vm5, %v648_v41  ;;  %v1000_v39 = vld [vmem:[#allocation4 + $0x8] sm:$0xff] }
 0x1ba   : > { %v1575_v42 = vpop.f32.mrf.mxu1  ;;  %v1601_v43 = vpop.f32.mrf.mxu0 }
 0x1bb   : > { %v999_v43 = vld [vmem:[#allocation4] sm:$0xff] }
 0x1bc   : > { %v553_v44 = vpop.f32.mrf.mxu1  ;;  %v2020_v45 = vld [vmem:[#allocation3 + $0x8] sm:$0xff]  ;;  %v2022_v46 = vld [vmem:[#allocation3 + $0x38] sm:$0xff] }
 0x1bd   : > { %567 = vst.msk [vmem:[#allocation3 + $0x18] sm:$0xff] %vm481_vm5, %v553_v44  ;;  %766 = vrot.lane.b32.xlu1 %v2020_v45, %s1844_s26  ;;  %814 = vrot.lane.b32.xlu0 %v2022_v46, %s1843_s25  ;;  %v1006_v44 = vld [vmem:[#allocation5 + $0x8] sm:$0xff] }
 0x1be   : > { %v1582_v47 = vpop.f32.mrf.mxu1 }
 0x1c0   : > { %v558_v48 = vpop.f32.mrf.mxu1  ;;  %v2029_v49 = vld [vmem:[#allocation3 + $0x10] sm:$0xff]  ;;  %v748_v0 = vld [vmem:[#allocation3 + $0x40] sm:$0xff] }
 0x1c1   : > { %568 = vst.msk [vmem:[#allocation3 + $0x20] sm:$0xff] %vm481_vm5, %v558_v48  ;;  %768 = vrot.lane.b32.xlu1 %v2029_v49, %s1844_s26  ;;  %v1005_v48 = vld [vmem:[#allocation5] sm:$0xff] }
 0x1c2   : > { %v1585_v50 = vpop.f32.mrf.mxu1 }
 0x1c4   : > { %v563_v51 = vpop.f32.mrf.mxu1  ;;  %v2036_v53 = vld [vmem:[#allocation3 + $0x18] sm:$0xff] }
 0x1c5   : > { %569 = vst.msk [vmem:[#allocation3 + $0x28] sm:$0xff] %vm481_vm5, %v563_v51  ;;  %764 = vrot.lane.b32.xlu1 %v2034_v52, %s1844_s26  ;;  %770 = vrot.lane.b32.xlu0 %v2036_v53, %s1844_s26 }
 0x1c6   : > { %v1588_v54 = vpop.f32.mrf.mxu1 }
 0x1c8   : > { %v723_v55 = vpop.f32.mrf.mxu1  ;;  %v2043_v56 = vld [vmem:[#allocation3 + $0x20] sm:$0xff] }
 0x1c9   : > { %737 = vst.msk [vmem:[#allocation3 + $0x48] sm:$0xff] %vm481_vm5, %v723_v55  ;;  %804 = vrot.lane.b32.xlu1 %v2029_v49, %s1843_s25  ;;  %808 = vrot.lane.b32.xlu0 %v2043_v56, %s1843_s25 }
 0x1ca   : > { %v1608_v57 = vpop.f32.mrf.mxu1 }
 0x1cc   : > { %v728_v58 = vpop.f32.mrf.mxu1  ;;  %v2050_v59 = vld [vmem:[#allocation3 + $0x28] sm:$0xff] }
 0x1cd   : > { %738 = vst.msk [vmem:[#allocation3 + $0x50] sm:$0xff] %vm481_vm5, %v728_v58  ;;  %800 = vrot.lane.b32.xlu1 %v2034_v52, %s1843_s25  ;;  %810 = vrot.lane.b32.xlu0 %v2050_v59, %s1843_s25 }
 0x1ce   : > { %v1611_v60 = vpop.f32.mrf.mxu1 }
 0x1d0   : > { %v733_v61 = vpop.f32.mrf.mxu1  ;;  %v749_v3 = vld [vmem:[#allocation3 + $0x48] sm:$0xff] }
 0x1d1   : > { %739 = vst.msk [vmem:[#allocation3 + $0x58] sm:$0xff] %vm481_vm5, %v733_v61  ;;  %806 = vrot.lane.b32.xlu0 %v2036_v53, %s1843_s25 }
 0x1d2   : > { %v1614_v62 = vpop.f32.mrf.mxu1 }
 0x1d4   : > { %v750_v63 = vld [vmem:[#allocation3 + $0x50] sm:$0xff] }
 0x1d5   : > { %802 = vrot.lane.b32.xlu0 %v2020_v45, %s1843_s25  ;;  %784 = vrot.lane.b32.xlu1 %v750_v63, %s1844_s26 }
 0x1d8   : > { %v751_v1 = vld [vmem:[#allocation3 + $0x58] sm:$0xff] }
 0x1d9   : > { %780 = vrot.lane.b32.xlu1 %v748_v0, %s1844_s26  ;;  %786 = vrot.lane.b32.xlu0 %v751_v1, %s1844_s26 }
 0x1dd   : > { %776 = vrot.lane.b32.xlu1 %v2014_v40, %s1844_s26  ;;  %782 = vrot.lane.b32.xlu0 %v749_v3, %s1844_s26 }
 0x1e1   : > { %772 = vrot.lane.b32.xlu1 %v2043_v56, %s1844_s26  ;;  %778 = vrot.lane.b32.xlu0 %v2022_v46, %s1844_s26 }
 0x1e5   : > { %820 = vrot.lane.b32.xlu1 %v750_v63, %s1843_s25  ;;  %774 = vrot.lane.b32.xlu0 %v2050_v59, %s1844_s26 }
 0x1e9   : > { %816 = vrot.lane.b32.xlu1 %v748_v0, %s1843_s25  ;;  %822 = vrot.lane.b32.xlu0 %v751_v1, %s1843_s25 }
 0x1ed   : > { %818 = vrot.lane.b32.xlu0 %v749_v3, %s1843_s25  ;;  %s1454_s25 = sshll.u32 %s1822_s18, 3 }
 0x1ee   : > { %s1014_s26 = scalar_lea.vmem %s1958_s30, %s1454_s25 [#allocation6] }
 0x22b   : > { %v813_v5 = vpop.permute.xlu1 %812 }
 0x22f   : > { %v767_v6 = vpop.permute.xlu1 %766  ;;  %v815_v7 = vpop.permute.xlu0 %814 }
 0x230   : > { %1503 = vmatprep.subr.mxu0 %v815_v7 }
 0x233   : > { %v769_v8 = vpop.permute.xlu1 %768 }
 0x237   : > { %v765_v9 = vpop.permute.xlu1 %764  ;;  %v771_v10 = vpop.permute.xlu0 %770 }
 0x238   : > { %1504 = vmatpush3.msra.mxu0 %v771_v10 }
 0x239   : > { %1505 = vmatprep.subr.mxu0 %v813_v5 }
 0x23a   : > { %1506 = vmatpush3.msra.mxu0 %v769_v8 }
 0x23b   : > { %v809_v11 = vpop.permute.xlu0 %808  ;;  %v805_v12 = vpop.permute.xlu1 %804 }
 0x23f   : > { %v811_v13 = vpop.permute.xlu0 %810  ;;  %v801_v14 = vpop.permute.xlu1 %800 }
 0x240   : > { %1507 = vmatprep.subr.mxu0 %v811_v13 }
 0x241   : > { %1508 = vmatpush3.msra.mxu0 %v767_v6 }
 0x242   : > { %1509 = vmatprep.subr.mxu0 %v809_v11 }
 0x243   : > { %1510 = vmatpush3.msra.mxu0 %v765_v9  ;;  %v807_v15 = vpop.permute.xlu0 %806 }
 0x244   : > { %1511 = vmatprep.subr.mxu0 %v807_v15 }
 0x245   : > { %1512 = vmatpush3.msra.mxu0 %v751_v1 }
 0x246   : > { %1513 = vmatprep.subr.mxu0 %v805_v12 }
 0x247   : > { %v803_v16 = vpop.permute.xlu0 %802  ;;  %v785_v17 = vpop.permute.xlu1 %784  ;;  %1514 = vmatpush3.msra.mxu0 %v750_v63 }
 0x248   : > { %1515 = vmatprep.subr.mxu0 %v803_v16 }
 0x249   : > { %1516 = vmatpush3.msra.mxu0 %v749_v3 }
 0x24a   : > { %1517 = vmatprep.subr.mxu0 %v801_v14 }
 0x24b   : > { %v781_v18 = vpop.permute.xlu1 %780  ;;  %v787_v19 = vpop.permute.xlu0 %786  ;;  %1518 = vmatpush3.msra.mxu0 %v748_v0 }
 0x24c   : > { %1519 = vmatprep.subr.mxu0 %v787_v19 }
 0x24d   : > { %1520 = vmatpush3.msra.mxu0 %v2022_v46 }
 0x24e   : > { %1521 = vmatprep.subr.mxu0 %v785_v17 }
 0x24f   : > { %v777_v20 = vpop.permute.xlu1 %776  ;;  %v783_v21 = vpop.permute.xlu0 %782  ;;  %1522 = vmatpush3.msra.mxu0 %v2014_v40 }
 0x250   : > { %1523 = vmatprep.subr.mxu0 %v783_v21 }
 0x251   : > { %1524 = vmatpush3.msra.mxu0 %v2050_v59 }
 0x252   : > { %1525 = vmatprep.subr.mxu0 %v781_v18 }
 0x253   : > { %v779_v22 = vpop.permute.xlu0 %778  ;;  %1526 = vmatpush3.msra.mxu0 %v2043_v56  ;;  %v773_v23 = vpop.permute.xlu1 %772 }
 0x254   : > { %1527 = vmatprep.subr.mxu0 %v779_v22 }
 0x255   : > { %1528 = vmatpush3.msra.mxu0 %v2036_v53 }
 0x256   : > { %1529 = vmatprep.subr.mxu0 %v777_v20 }
 0x257   : > { %v775_v24 = vpop.permute.xlu0 %774  ;;  %1530 = vmatpush3.msra.mxu0 %v2029_v49  ;;  %v821_v27 = vpop.permute.xlu1 %820 }
 0x258   : > { %1531 = vmatprep.subr.mxu0 %v775_v24 }
 0x259   : > { %1532 = vmatpush3.msra.mxu0 %v2020_v45 }
 0x25a   : > { %1533 = vmatprep.subr.mxu0 %v773_v23 }
 0x25b   : > { %v823_v28 = vpop.permute.xlu0 %822  ;;  %1534 = vmatpush3.msra.mxu0 %v2034_v52  ;;  %v817_v31 = vpop.permute.xlu1 %816 }
 0x25c   : > { %1615 = vmatprep.subr.mxu1 %v823_v28  ;;  %914 = vmatmul.mubr.f32.vlgmr.msra.gmra.mxu0 %v836_v25 }
 0x25d   : > { %1616 = vmatpush3.msra.mxu1 %v823_v28  ;;  %918 = vmatprep.mubr.f32.mxu0 %v840_v26 }
 0x25e   : > { %1617 = vmatprep.subr.mxu1 %v821_v27 }
 0x25f   : > { %1618 = vmatpush3.msra.mxu1 %v821_v27  ;;  %v819_v30 = vpop.permute.xlu0 %818 }
 0x260   : > { %1619 = vmatprep.subr.mxu1 %v819_v30  ;;  %919 = vmatmul.mubr.f32.gmra.mxu0 %v839_v29 }
 0x261   : > { %1620 = vmatpush3.msra.mxu1 %v819_v30 }
 0x262   : > { %1621 = vmatprep.subr.mxu1 %v817_v31 }
 0x263   : > { %1622 = vmatpush3.msra.mxu1 %v817_v31 }
 0x264   : > { %1624 = vmatmul.mubr.msk.f32.vlgmr.msra.gmra.mxu1 %vm842_vm6, %v841_v32 }
 0x31c   : > { %v1535_v33 = vpop.f32.mrf.mxu0 }
 0x31e   : > { %v1536_v34 = vpop.f32.mrf.mxu0 }
 0x31f   : > { %v1537_v40 = vadd.f32 %v1536_v34, %v1535_v33 }
 0x320   : > { %v1538_v35 = vpop.f32.mrf.mxu0 }
 0x322   : > { %v1539_v36 = vpop.f32.mrf.mxu0 }
 0x323   : > { %v1540_v37 = vadd.f32 %v1539_v36, %v1538_v35 }
 0x324   : > { %v1625_v38 = vpop.f32.mrf.mxu1 }
 0x325   : > { %v996_v41 = vadd.f32 %v1625_v38, %v1540_v37 }
 0x326   : > { %v990_v42 = vpop.f32.mrf.mxu1 }
 0x327   : > { %v991_v45 = vadd.f32 %v1537_v40, %v990_v42  ;;  %v1002_v46 = vadd.f32 %v1000_v39, %v996_v41  ;;  %v1008_v47 = vmul.f32 %v996_v41, %v996_v41  ;;  %1456 = vst.msk [vmem:[%s1014_s26 + $0x20] sm:$0xff] %vm842_vm6, %v996_v41 }
 0x329   : > { %v1001_v49 = vadd.f32 %v999_v43, %v991_v45  ;;  %v1007_v50 = vmul.f32 %v991_v45, %v991_v45  ;;  %1015 = vst.msk [vmem:[%s1014_s26] sm:$0xff] %vm842_vm6, %v991_v45  ;;  %1004 = vst.msk [vmem:[#allocation4 + $0x8] sm:$0xff] %vm842_vm6, %v1002_v46  ;;  %v1010_v51 = vadd.f32 %v1008_v47, %v1006_v44  ;;  %1022 = sbr.rel (%p1457_p1) target bundleno = 1060 (0x424), region = 44 }
 0x32b   : > { %1003 = vst.msk [vmem:[#allocation4] sm:$0xff] %vm842_vm6, %v1001_v49  ;;  %v1009_v52 = vadd.f32 %v1007_v50, %v1005_v48  ;;  %1012 = vst.msk [vmem:[#allocation5 + $0x8] sm:$0xff] %vm842_vm6, %v1010_v51 }
 0x32d   : > { %1011 = vst.msk [vmem:[#allocation5] sm:$0xff] %vm842_vm6, %v1009_v52 }
 0x330   : > { %v1170_v58 = vld [vmem:[#allocation4 + $0x8] sm:$0xff]  ;;  %v1050_v37 = vld [vmem:[%s1958_s30] sm:$0xff]  ;;  %v1052_v39 = vld [vmem:[%s1958_s30 + $0x10] sm:$0xff] }
 0x331   : > { %v1171_v60 = vsel %vm842_vm6, %v1170_v58, 0.0  ;;  %v1051_v38 = vld [vmem:[%s1958_s30 + $0x8] sm:$0xff]  ;;  %v1053_v40 = vld [vmem:[%s1958_s30 + $0x18] sm:$0xff] }
 0x332   : > { %v1023_v54 = vld [vmem:[#allocation4] sm:$0xff]  ;;  %v1180_v55 = vld [vmem:[#allocation5 + $0x8] sm:$0xff]  ;;  %v1459_v58 = vld [vmem:[%s1958_s30 + $0x28] sm:$0xff] }
 0x333   : > { %v1024_v57 = vsel %vm842_vm6, %v1023_v54, 0.0  ;;  %v1181_v59 = vsel %vm842_vm6, %v1180_v55, 0.0  ;;  %v1458_v55 = vld [vmem:[%s1958_s30 + $0x20] sm:$0xff] }
 0x334   : > { %v1033_v53 = vld [vmem:[#allocation5] sm:$0xff]  ;;  %1025 = vadd.xlane.f32.xlu0 %v1024_v57 }
 0x335   : > { %v1034_v56 = vsel %vm842_vm6, %v1033_v53, 0.0 }
 0x336   : > { %1035 = vadd.xlane.f32.xlu1 %v1034_v56 }
 0x338   : > { %1172 = vadd.xlane.f32.xlu0 %v1171_v60 }
 0x33a   : > { %1182 = vadd.xlane.f32.xlu1 %v1181_v59 }
 0x3bd   : > { %v1026_v62 = vpop.xlane.xlu0 %1025 }
 0x3be   : > { %v1027_v0 = vrot.slane %v1026_v62, 4 }
 0x3bf   : > { %v1036_v61 = vpop.xlane.xlu1 %1035 }
 0x3c0   : > { %v1037_v63 = vrot.slane %v1036_v61, 4  ;;  %v1028_v2 = vadd.f32 %v1027_v0, %v1026_v62  ;;  %v1460_v62 = vld [vmem:[%s1958_s30 + $0x30] sm:$0xff] }
 0x3c1   : > { %v1173_v4 = vpop.xlane.xlu0 %1172 }
 0x3c2   : > { %v1038_v1 = vadd.f32 %v1037_v63, %v1036_v61  ;;  %v1029_v6 = vrot.slane %v1028_v2, 2  ;;  %v1174_v8 = vrot.slane %v1173_v4, 4 }
 0x3c3   : > { %v1183_v3 = vpop.xlane.xlu1 %1182 }
 0x3c4   : > { %v1039_v5 = vrot.slane %v1038_v1, 2  ;;  %v1184_v7 = vrot.slane %v1183_v3, 4  ;;  %v1030_v10 = vadd.f32 %v1029_v6, %v1028_v2  ;;  %v1175_v12 = vadd.f32 %v1174_v8, %v1173_v4 }
 0x3c6   : > { %v1040_v9 = vadd.f32 %v1039_v5, %v1038_v1  ;;  %v1185_v11 = vadd.f32 %v1184_v7, %v1183_v3  ;;  %v1031_v14 = vrot.slane %v1030_v10, 1  ;;  %v1176_v16 = vrot.slane %v1175_v12, 2  ;;  %v1461_v1 = vld [vmem:[%s1958_s30 + $0x38] sm:$0xff] }
 0x3c8   : > { %v1041_v13 = vrot.slane %v1040_v9, 1  ;;  %v1186_v15 = vrot.slane %v1185_v11, 2  ;;  %v1032_v18 = vadd.f32 %v1031_v14, %v1030_v10  ;;  %v1177_v20 = vadd.f32 %v1176_v16, %v1175_v12 }
 0x3ca   : > { %v1042_v17 = vadd.f32 %v1041_v13, %v1040_v9  ;;  %v1187_v19 = vadd.f32 %v1186_v15, %v1185_v11  ;;  %v1043_v21 = vmul.f32 0.0009765625, %v1032_v18  ;;  %v1178_v23 = vrot.slane %v1177_v20, 1 }
 0x3cc   : > { %v1188_v22 = vrot.slane %v1187_v19, 1  ;;  %v1044_v24 = vmul.f32 0.0009765625, %v1042_v17  ;;  %v1045_v25 = vmul.f32 %v1043_v21, %v1043_v21  ;;  %v1179_v27 = vadd.f32 %v1178_v23, %v1177_v20 }
 0x3cd   : > { %v1054_v41 = vsub.f32 %v1050_v37, %v1043_v21  ;;  %v1055_v42 = vsub.f32 %v1051_v38, %v1043_v21  ;;  %v1056_v43 = vsub.f32 %v1052_v39, %v1043_v21  ;;  %v1057_v44 = vsub.f32 %v1053_v40, %v1043_v21 }
 0x3ce   : > { %v1189_v26 = vadd.f32 %v1188_v22, %v1187_v19  ;;  %v1046_v28 = vsub.f32 %v1044_v24, %v1045_v25  ;;  %v1190_v29 = vmul.f32 0.0009765625, %v1179_v27 }
 0x3d0   : > { %v1047_v30 = vmax.f32 %v1046_v28, 0.0  ;;  %v1191_v31 = vmul.f32 0.0009765625, %v1189_v26  ;;  %v1192_v32 = vmul.f32 %v1190_v29, %v1190_v29  ;;  %v1202_v2 = vsub.f32 %v1458_v55, %v1190_v29 }
 0x3d1   : > { %v1203_v5 = vsub.f32 %v1459_v58, %v1190_v29  ;;  %v1204_v8 = vsub.f32 %v1460_v62, %v1190_v29  ;;  %v1205_v11 = vsub.f32 %v1461_v1, %v1190_v29 }
 0x3d2   : > { %v1048_v33 = vadd.f32 1e-05, %v1047_v30  ;;  %v1193_v34 = vsub.f32 %v1191_v31, %v1192_v32 }
 0x3d4   : > { %1710 = vrsqrt.f32 %v1048_v33  ;;  %v1194_v35 = vmax.f32 %v1193_v34, 0.0 }
 0x3d6   : > { %v1195_v36 = vadd.f32 1e-05, %v1194_v35 }
 0x3d8   : > { %1712 = vrsqrt.f32 %v1195_v36 }
 0x3e1   : > { %v1711_v45 = vpop.eup %1710 }
 0x3e2   : > { %v1058_v46 = vmul.f32 %v1711_v45, %v1054_v41  ;;  %v1059_v47 = vmul.f32 %v1711_v45, %v1055_v42  ;;  %v1060_v48 = vmul.f32 %v1711_v45, %v1056_v43  ;;  %v1061_v49 = vmul.f32 %v1711_v45, %v1057_v44 }
 0x3e4   : > { %v2123_v50 = vmul.f32 0.70710677, %v1058_v46  ;;  %v2125_v51 = vmul.f32 0.70710677, %v1059_v47  ;;  %v2127_v52 = vmul.f32 0.70710677, %v1060_v48 }
 0x3e5   : > { %v2129_v53 = vmul.f32 0.70710677, %v1061_v49  ;;  %v1713_v59 = vpop.eup %1712  ;;  %v2160_v23 = vmul.f32 0.5, %v1058_v46  ;;  %v2164_v27 = vmul.f32 0.5, %v1059_v47  ;;  %v2167_v31 = vmul.f32 0.5, %v1060_v48 }
 0x3e6   : > { %v1078_v54 = vand.u32 2147483647, %v2123_v50  ;;  %v1079_v56 = vand.u32 2147483647, %v2125_v51  ;;  %v1080_v57 = vand.u32 2147483647, %v2127_v52  ;;  %v2139_v9 = vmul.f32 %v1713_v59, %v1202_v2 }
 0x3e7   : > { %v1081_v60 = vand.u32 2147483647, %v2129_v53  ;;  %v2141_v12 = vmul.f32 %v1713_v59, %v1203_v5  ;;  %v2143_v13 = vmul.f32 %v1713_v59, %v1204_v8  ;;  %v2145_v14 = vmul.f32 %v1713_v59, %v1205_v11 }
 0x3e8   : > { %v1082_v61 = vmul.f32 0.3275911, %v1078_v54  ;;  %v1083_v63 = vmul.f32 0.3275911, %v1079_v56  ;;  %v1084_v0 = vmul.f32 0.3275911, %v1080_v57 }
 0x3e9   : > { %v1085_v3 = vmul.f32 0.3275911, %v1081_v60  ;;  %v2148_v15 = vmul.f32 0.70710677, %v2139_v9  ;;  %v2151_v16 = vmul.f32 0.70710677, %v2141_v12 }
 0x3ea   : > { %v1086_v4 = vadd.f32 1.0, %v1082_v61  ;;  %v1087_v6 = vadd.f32 1.0, %v1083_v63  ;;  %v1088_v7 = vadd.f32 1.0, %v1084_v0  ;;  %v2154_v17 = vmul.f32 0.70710677, %v2143_v13 }
 0x3eb   : > { %v1089_v10 = vadd.f32 1.0, %v1085_v3  ;;  %v1130_v18 = vsub.f32 0.0, %v1078_v54  ;;  %v2157_v19 = vmul.f32 0.70710677, %v2145_v14  ;;  %v1226_v20 = vand.u32 2147483647, %v2148_v15 }
 0x3ec   : > { %1714 = vrcp.f32 %v1086_v4  ;;  %v1131_v21 = vsub.f32 0.0, %v1079_v56  ;;  %v1132_v22 = vsub.f32 0.0, %v1080_v57  ;;  %v1133_v24 = vsub.f32 0.0, %v1081_v60 }
 0x3ed   : > { %1716 = vrcp.f32 %v1087_v6  ;;  %v1227_v25 = vand.u32 2147483647, %v2151_v16  ;;  %v1228_v26 = vand.u32 2147483647, %v2154_v17  ;;  %v1134_v28 = vmul.f32 %v1130_v18, %v1078_v54 }
 0x3ee   : > { %1718 = vrcp.f32 %v1088_v7  ;;  %v1229_v29 = vand.u32 2147483647, %v2157_v19  ;;  %v1230_v30 = vmul.f32 0.3275911, %v1226_v20  ;;  %v1135_v32 = vmul.f32 %v1131_v21, %v1079_v56 }
 0x3ef   : > { %1720 = vrcp.f32 %v1089_v10  ;;  %v1231_v33 = vmul.f32 0.3275911, %v1227_v25  ;;  %v1232_v34 = vmul.f32 0.3275911, %v1228_v26  ;;  %v2169_v35 = vmul.f32 0.5, %v1061_v49 }
 0x3f0   : > { %v1136_v36 = vmul.f32 %v1132_v22, %v1080_v57  ;;  %v1233_v37 = vmul.f32 0.3275911, %v1229_v29  ;;  %v1234_v38 = vadd.f32 1.0, %v1230_v30  ;;  %vm1070_vm7 = vcmp.lt.f32.partialorder %v2123_v50, 0.0 }
 0x3f1   : > { %v1137_v39 = vmul.f32 %v1133_v24, %v1081_v60  ;;  %v1235_v40 = vadd.f32 1.0, %v1231_v33  ;;  %v1236_v41 = vadd.f32 1.0, %v1232_v34  ;;  %vm1071_vm8 = vcmp.lt.f32.partialorder %v2125_v51, 0.0 }
 0x3f2   : > { %v1138_v43 = vmul.f32 1.442695, %v1134_v28  ;;  %v1237_v44 = vadd.f32 1.0, %v1233_v37  ;;  %1722 = vrcp.f32 %v1234_v38  ;;  %v1278_v45 = vsub.f32 0.0, %v1226_v20 }
 0x3f3   : > { %vm1072_vm9 = vcmp.lt.f32.partialorder %v2127_v52, 0.0  ;;  %v1140_v48 = vmul.f32 1.442695, %v1135_v32  ;;  %1724 = vrcp.f32 %v1235_v40  ;;  %v1279_v49 = vsub.f32 0.0, %v1227_v25 }
 0x3f4   : > { %v1142_v56 = vmul.f32 1.442695, %v1136_v36  ;;  %1726 = vrcp.f32 %v1236_v41  ;;  %v1280_v57 = vsub.f32 0.0, %v1228_v26  ;;  %v1281_v61 = vsub.f32 0.0, %v1229_v29 }
 0x3f5   : > { %1728 = vrcp.f32 %v1237_v44  ;;  %v1144_v0 = vmul.f32 1.442695, %v1137_v39  ;;  %v1282_v1 = vmul.f32 %v1278_v45, %v1226_v20  ;;  %v1283_v4 = vmul.f32 %v1279_v49, %v1227_v25 }
 0x3f6   : > { %1730 = vpow2.f32 %v1138_v43  ;;  %v1284_v7 = vmul.f32 %v1280_v57, %v1228_v26  ;;  %v1285_v11 = vmul.f32 %v1281_v61, %v1229_v29  ;;  %vm1073_vm10 = vcmp.lt.f32.partialorder %v2129_v53, 0.0 }
 0x3f7   : > { %1732 = vpow2.f32 %v1140_v48  ;;  %v1286_v20 = vmul.f32 1.442695, %v1282_v1  ;;  %v1288_v25 = vmul.f32 1.442695, %v1283_v4  ;;  %v1845_v28 = vmov 1.0  }
 0x3f8   : > { %1734 = vpow2.f32 %v1142_v56  ;;  %v1074_v26 = vsel %vm1070_vm7, -1.0, %v1845_v28  ;;  %v1290_v29 = vmul.f32 1.442695, %v1284_v7  ;;  %v1075_v33 = vsel %vm1071_vm8, -1.0, %v1845_v28 }
 0x3f9   : > { %v2172_v42 = vpop.eup %1714  ;;  %1736 = vpow2.f32 %v1144_v0  ;;  %v1292_v37 = vmul.f32 1.442695, %v1285_v11  ;;  %v1076_v38 = vsel %vm1072_vm9, -1.0, %v1845_v28  ;;  %v1077_v41 = vsel %vm1073_vm10, -1.0, %v1845_v28 }
 0x3fa   : > { %v2175_v46 = vpop.eup %1716  ;;  %v1094_v47 = vmul.f32 1.0614054, %v2172_v42  ;;  %1738 = vpow2.f32 %v1286_v20  ;;  %vm1218_vm11 = vcmp.lt.f32.partialorder %v2148_v15, 0.0  ;;  %vm1219_vm12 = vcmp.lt.f32.partialorder %v2151_v16, 0.0 }
 0x3fb   : > { %v2179_v54 = vpop.eup %1718  ;;  %v1095_v55 = vmul.f32 1.0614054, %v2175_v46  ;;  %1740 = vpow2.f32 %v1288_v25  ;;  %vm1220_vm13 = vcmp.lt.f32.partialorder %v2154_v17, 0.0  ;;  %vm1221_vm14 = vcmp.lt.f32.partialorder %v2157_v19, 0.0 }
 0x3fc   : > { %v2182_v58 = vpop.eup %1720  ;;  %v1096_v59 = vmul.f32 1.0614054, %v2179_v54  ;;  %v1098_v60 = vadd.f32 -1.4531521, %v1094_v47  ;;  %1742 = vpow2.f32 %v1290_v29  ;;  %v1223_v15 = vsel %vm1219_vm12, -1.0, %v1845_v28 }
 0x3fd   : > { %v1097_v62 = vmul.f32 1.0614054, %v2182_v58  ;;  %v1099_v63 = vadd.f32 -1.4531521, %v1095_v55  ;;  %1744 = vpow2.f32 %v1292_v37  ;;  %v1225_v17 = vsel %vm1221_vm14, -1.0, %v1845_v28 }
 0x3fe   : > { %v1100_v2 = vadd.f32 -1.4531521, %v1096_v59  ;;  %v1102_v3 = vmul.f32 %v2172_v42, %v1098_v60 }
 0x3ff   : > { %v1101_v5 = vadd.f32 -1.4531521, %v1097_v62  ;;  %v1103_v6 = vmul.f32 %v2175_v46, %v1099_v63  ;;  %v2204_v40 = vpop.eup %1722 }
 0x400   : > { %v1104_v8 = vmul.f32 %v2179_v54, %v1100_v2  ;;  %v1106_v10 = vadd.f32 1.4214138, %v1102_v3  ;;  %v2210_v44 = vpop.eup %1724  ;;  %v1242_v47 = vmul.f32 1.0614054, %v2204_v40 }
 0x401   : > { %v1105_v18 = vmul.f32 %v2182_v58, %v1101_v5  ;;  %v1107_v21 = vadd.f32 1.4214138, %v1103_v6  ;;  %v2214_v48 = vpop.eup %1726  ;;  %v1243_v53 = vmul.f32 1.0614054, %v2210_v44 }
 0x402   : > { %v1108_v22 = vadd.f32 1.4214138, %v1104_v8  ;;  %v1110_v24 = vmul.f32 %v2172_v42, %v1106_v10  ;;  %v2218_v56 = vpop.eup %1728  ;;  %v1244_v60 = vmul.f32 1.0614054, %v2214_v48  ;;  %v1246_v61 = vadd.f32 -1.4531521, %v1242_v47 }
 0x403   : > { %v1109_v30 = vadd.f32 1.4214138, %v1105_v18  ;;  %v1111_v32 = vmul.f32 %v2175_v46, %v1107_v21  ;;  %v1245_v0 = vmul.f32 1.0614054, %v2218_v56  ;;  %v1247_v1 = vadd.f32 -1.4531521, %v1243_v53  ;;  %v1731_v2 = vpop.eup %1730 }
 0x404   : > { %v1112_v34 = vmul.f32 %v2179_v54, %v1108_v22  ;;  %v1114_v36 = vadd.f32 -0.28449672, %v1110_v24  ;;  %v1248_v5 = vadd.f32 -1.4531521, %v1244_v60  ;;  %v1250_v6 = vmul.f32 %v2204_v40, %v1246_v61  ;;  %v1733_v7 = vpop.eup %1732 }
 0x405   : > { %v1113_v39 = vmul.f32 %v2182_v58, %v1109_v30  ;;  %v1115_v50 = vadd.f32 -0.28449672, %v1111_v32  ;;  %v1249_v11 = vadd.f32 -1.4531521, %v1245_v0  ;;  %v1251_v18 = vmul.f32 %v2210_v44, %v1247_v1  ;;  %v1735_v21 = vpop.eup %1734 }
 0x406   : > { %v1116_v51 = vadd.f32 -0.28449672, %v1112_v34  ;;  %v1118_v43 = vmul.f32 %v2172_v42, %v1114_v36  ;;  %v1252_v22 = vmul.f32 %v2214_v48, %v1248_v5  ;;  %v1254_v24 = vadd.f32 1.4214138, %v1250_v6  ;;  %v1737_v25 = vpop.eup %1736 }
 0x407   : > { %v1117_v45 = vadd.f32 -0.28449672, %v1113_v39  ;;  %v1119_v52 = vmul.f32 %v2175_v46, %v1115_v50  ;;  %v1253_v32 = vmul.f32 %v2218_v56, %v1249_v11  ;;  %v1255_v29 = vadd.f32 1.4214138, %v1251_v18 }
 0x408   : > { %v1120_v49 = vmul.f32 %v2179_v54, %v1116_v51  ;;  %v1122_v55 = vadd.f32 0.2548296, %v1118_v43  ;;  %v1258_v37 = vmul.f32 %v2204_v40, %v1254_v24 }
 0x409   : > { %v1121_v57 = vmul.f32 %v2182_v58, %v1117_v45  ;;  %v1123_v59 = vadd.f32 0.2548296, %v1119_v52  ;;  %v1257_v51 = vadd.f32 1.4214138, %v1253_v32  ;;  %v1210_v32 = vmul.f32 0.5, %v2139_v9 }
 0x40a   : > { %v1124_v62 = vadd.f32 0.2548296, %v1120_v49  ;;  %v1126_v63 = vmul.f32 %v2172_v42, %v1122_v55  ;;  %v1262_v47 = vadd.f32 -0.28449672, %v1258_v37  ;;  %v1739_v49 = vpop.eup %1738  ;;  %v1212_v37 = vmul.f32 0.5, %v2143_v13 }
 0x40b   : > { %v1125_v3 = vadd.f32 0.2548296, %v1121_v57  ;;  %v1127_v4 = vmul.f32 %v2175_v46, %v1123_v59  ;;  %v1261_v57 = vmul.f32 %v2218_v56, %v1257_v51  ;;  %v1741_v60 = vpop.eup %1740  ;;  %v1213_v51 = vmul.f32 0.5, %v2145_v14 }
 0x40c   : > { %v1128_v8 = vmul.f32 %v2179_v54, %v1124_v62  ;;  %v1146_v10 = vmul.f32 %v1731_v2, %v1126_v63  ;;  %v1256_v54 = vadd.f32 1.4214138, %v1252_v22  ;;  %v1743_v0 = vpop.eup %1742 }
 0x40d   : > { %v1129_v42 = vmul.f32 %v2182_v58, %v1125_v3  ;;  %v1147_v20 = vmul.f32 %v1733_v7, %v1127_v4  ;;  %v1259_v58 = vmul.f32 %v2210_v44, %v1255_v29  ;;  %v1265_v2 = vadd.f32 -0.28449672, %v1261_v57  ;;  %v1745_v3 = vpop.eup %1744 }
 0x40e   : > { %v1148_v30 = vmul.f32 %v1735_v21, %v1128_v8  ;;  %v1150_v46 = vsub.f32 1.0, %v1146_v10  ;;  %v1260_v52 = vmul.f32 %v2214_v48, %v1256_v54 }
 0x40f   : > { %v1149_v34 = vmul.f32 %v1737_v25, %v1129_v42  ;;  %v1151_v36 = vsub.f32 1.0, %v1147_v20  ;;  %v1263_v59 = vadd.f32 -0.28449672, %v1259_v58  ;;  %v1269_v8 = vmul.f32 %v2218_v56, %v1265_v2 }
 0x410   : > { %v1152_v39 = vsub.f32 1.0, %v1148_v30  ;;  %v1154_v50 = vmul.f32 %v1150_v46, %v1074_v26  ;;  %v1264_v63 = vadd.f32 -0.28449672, %v1260_v52  ;;  %v1266_v26 = vmul.f32 %v2204_v40, %v1262_v47 }
 0x411   : > { %v1153_v43 = vsub.f32 1.0, %v1149_v34  ;;  %v1155_v45 = vmul.f32 %v1151_v36, %v1075_v33  ;;  %v1224_v46 = vsel %vm1220_vm13, -1.0, %v1845_v28  ;;  %v1211_v34 = vmul.f32 0.5, %v2141_v12 }
 0x412   : > { %v1156_v55 = vmul.f32 %v1152_v39, %v1076_v38  ;;  %v1158_v53 = vadd.f32 1.0, %v1154_v50  ;;  %v1267_v38 = vmul.f32 %v2210_v44, %v1263_v59  ;;  %v1270_v6 = vadd.f32 0.2548296, %v1266_v26 }
 0x413   : > { %v1157_v61 = vmul.f32 %v1153_v43, %v1077_v41  ;;  %v1159_v62 = vadd.f32 1.0, %v1155_v45  ;;  %v1268_v41 = vmul.f32 %v2214_v48, %v1264_v63 }
 0x414   : > { %v1160_v1 = vadd.f32 1.0, %v1156_v55  ;;  %v1162_v33 = vmul.f32 %v1158_v53, %v2160_v23  ;;  %v1271_v10 = vadd.f32 0.2548296, %v1267_v38  ;;  %v1274_v18 = vmul.f32 %v2204_v40, %v1270_v6 }
 0x415   : > { %v1161_v4 = vadd.f32 1.0, %v1157_v61  ;;  %v1163_v5 = vmul.f32 %v1159_v62, %v2164_v27  ;;  %v1272_v11 = vadd.f32 0.2548296, %v1268_v41  ;;  %v1273_v27 = vadd.f32 0.2548296, %v1269_v8 }
 0x416   : > { %v1164_v7 = vmul.f32 %v1160_v1, %v2167_v31  ;;  %1166 = vst.msk [vmem:[%s1958_s30] sm:$0xff] %vm842_vm6, %v1162_v33  ;;  %v1275_v21 = vmul.f32 %v2210_v44, %v1271_v10  ;;  %v1294_v42 = vmul.f32 %v1739_v49, %v1274_v18  ;;  %v1222_v44 = vsel %vm1218_vm11, -1.0, %v1845_v28 }
 0x417   : > { %v1165_v23 = vmul.f32 %v1161_v4, %v2169_v35  ;;  %1167 = vst.msk [vmem:[%s1958_s30 + $0x8] sm:$0xff] %vm842_vm6, %v1163_v5  ;;  %v1276_v31 = vmul.f32 %v2214_v48, %v1272_v11  ;;  %v1277_v35 = vmul.f32 %v2218_v56, %v1273_v27 }
 0x418   : > { %1168 = vst.msk [vmem:[%s1958_s30 + $0x10] sm:$0xff] %vm842_vm6, %v1164_v7  ;;  %v1295_v20 = vmul.f32 %v1741_v60, %v1275_v21  ;;  %v1298_v22 = vsub.f32 1.0, %v1294_v42 }
 0x419   : > { %1169 = vst.msk [vmem:[%s1958_s30 + $0x18] sm:$0xff] %vm842_vm6, %v1165_v23  ;;  %v1296_v40 = vmul.f32 %v1743_v0, %v1276_v31  ;;  %v1297_v24 = vmul.f32 %v1745_v3, %v1277_v35 }
 0x41a   : > { %v1299_v25 = vsub.f32 1.0, %v1295_v20  ;;  %v1302_v48 = vmul.f32 %v1298_v22, %v1222_v44 }
 0x41b   : > { %v1300_v30 = vsub.f32 1.0, %v1296_v40  ;;  %v1301_v16 = vsub.f32 1.0, %v1297_v24 }
 0x41c   : > { %v1303_v56 = vmul.f32 %v1299_v25, %v1223_v15  ;;  %v1306_v29 = vadd.f32 1.0, %v1302_v48 }
 0x41d   : > { %v1304_v19 = vmul.f32 %v1300_v30, %v1224_v46  ;;  %v1305_v36 = vmul.f32 %v1301_v16, %v1225_v17 }
 0x41e   : > { %v1307_v54 = vadd.f32 1.0, %v1303_v56  ;;  %v1310_v50 = vmul.f32 %v1306_v29, %v1210_v32 }
 0x41f   : > { %v1308_v39 = vadd.f32 1.0, %v1304_v19  ;;  %v1309_v58 = vadd.f32 1.0, %v1305_v36 }
 0x420   : > { %v1311_v43 = vmul.f32 %v1307_v54, %v1211_v34  ;;  %1462 = vst.msk [vmem:[%s1958_s30 + $0x20] sm:$0xff] %vm842_vm6, %v1310_v50 }
 0x421   : > { %v1312_v9 = vmul.f32 %v1308_v39, %v1212_v37  ;;  %v1313_v28 = vmul.f32 %v1309_v58, %v1213_v51 }
 0x422   : > { %1463 = vst.msk [vmem:[%s1958_s30 + $0x28] sm:$0xff] %vm842_vm6, %v1311_v43 }
 0x423   : > { %1464 = vst.msk [vmem:[%s1958_s30 + $0x30] sm:$0xff] %vm842_vm6, %v1312_v9  ;;  %1465 = vst.msk [vmem:[%s1958_s30 + $0x38] sm:$0xff] %vm842_vm6, %v1313_v28 }
 0x424 PF: > { %s1472_s18 = sshll.u32 %s1826_s19, 10  ;;  %s1332_s10 = sshll.u32 %s1958_s30, 4  ;;  %s2282_s10 = int_to_ptr.vmem [resolvable:$true] %s1332_s10 }
 0x425   : > { %s2279_s9 = scalar_lea.hbm %s2341_s4, %s1472_s18  ;;  %s2348_s11 = sand.u32 1, %s1814_s16  }
 0x426   : > { %s2286_s12 = scalar_lea.sflag [#allocation7], %s2348_s11  ;;  %s1746_s13 = scalar_lea.vmem %s2282_s10, 1024 }
 0x427   : > { %p1747_p2 = scmp.ne.s32.totalorder %s2282_s10, %s1746_s13  ;;  %s1846_s19 = smov [#allocation6]  }
 0x428   : > { %s1750_s14 = sshll.u32 %s1846_s19, 4  ;;  %s1751_s14 = int_to_ptr.vmem [resolvable:$false] %s1750_s14 }
 0x429   : > { %p1748_p4 = pnand %p1747_p2, %p1923_p3  ;;  %s1752_s23 = scalar_lea.vmem %s1751_s14, 2048 }
 0x42a   : > { %p1753_p6 = scmp.lt.s32.totalorder %s2282_s10, %s1751_s14  ;;  %p1754_p7 = scmp.lt.s32.totalorder %s1752_s23, %s1746_s13 }
 0x42b   : > { %p1749_p5 = pneg %p1748_p4 }
 0x42c   : > { %p1755_p8 = por %p1754_p7, %p1753_p6 }
 0x42e   : > { %p1756_p10 = pnand %p1755_p8, %p1749_p5 }
 0x430   : > { %1759 = shalt.err (!%p1756_p10)
}
 0x431   : > { %s1760_s30 = scalar_lea.hbm %s2279_s9, 1024  ;;  %s1764_s8 = scalar_lea.hbm %s2341_s4, 2048 }
 0x432   : > { %p1761_p11 = scmp.ne.s32.totalorder %s2279_s9, %s1760_s30  ;;  %p1765_p0 = scmp.lt.s32.totalorder %s2279_s9, %s2341_s4 }
 0x433   : > { %p1766_p1 = scmp.lt.s32.totalorder %s1764_s8, %s1760_s30 }
 0x434   : > { %p1762_p12 = pnand %p1761_p11, %p1923_p3 }
 0x435   : > { %p1767_p2 = por %p1766_p1, %p1765_p0 }
 0x436   : > { %p1763_p13 = pneg %p1762_p12 }
 0x438   : > { %p1768_p4 = pnand %p1767_p2, %p1763_p13 }
 0x43a   : > { %1771 = shalt.err (!%p1768_p4)
}
 0x43b   : > { %s1847_s18 = smov 128   ;;  %s1848_s6 = smov 8  }
 0x43c   : > { %1631 = dma.vmem_to_hbm [thread:$0]  (%p1923_p3), %s2282_s10, 1024, %s2279_s9, %s2286_s12, %s1847_s18, %s1847_s18, %s1848_s6  }
 0x43d PF: > { %p1637_p5 = scmp.ge.s32.totalorder %s1838_s22, 2  ;;  %s1347_s7 = sand.u32 1, %s1810_s15  }
 0x43e   : > { %s1348_s11 = scalar_lea.sflag [#allocation7], %s1347_s7 }
 0x43f   : > { %p1634_p6 = pnand %p1637_p5, %p1933_p9 }
 0x441   : > { %p1635_p7 = pneg %p1634_p6 }
 0x443   : > { %1805 = dma.done.wait (%p1635_p7), %s1348_s11, 1024  }
 0x444   : > { %1807 = vsyncadd (%p1635_p7), %s1348_s11, 4294966272  ;;  %s17_s22 = sadd.s32 1, %s1838_s22   ;;  %s2349_s27 = sld [smem:[#allocation9_spill]] }
 0x445   : > { %p14_p8 = scmp.ge.s32.totalorder %s17_s22, 10   ;;  %s2350_s9 = sld [smem:[#allocation10_spill]] }
 0x446   : > { %s2351_s15 = smov %s1814_s16  ;;  %s2352_s16 = smov %s1818_s17 }
 0x447   : > { %s2353_s17 = smov %s1941_s5  ;;  %s2354_s18 = smov %s1830_s20 }
 0x448   : > { %s2355_s19 = smov %s1834_s21  ;;  %16 = sbr.rel (!%p14_p8) target bundleno = 5 (0x5), region = 85 }
 0x44a   : > { %s2356_s20 = smov %s2349_s27 }
 0x44b   : > { %s2357_s21 = smov %s2350_s9 }
 0x44d   :  { %1353 = vsyncpa [#allocation7], 1 }
 0x44e   :  { %1355 = vsyncpa [#allocation7 + $0x1], 1 }

</bundles_post_ra>
